<compile_context>
chip_gen: v6e
topology: v6e:2x2x1
jax: 0.10.0
libtpu: 0.0.40
codegen_flags: <defaults>
</compile_context>

<pallas_src>
import functools

import jax
import jax.numpy as jnp
from jax import lax
from jax.experimental import pallas as pl
from jax.experimental.pallas import tpu as pltpu

ALPHA = 0.02      # LeakyReLU negative slope (GAT alpha, matches module default)
LN_EPS = 1e-5


def _gelu(x):
    # TODO(synk): PyTorch F.gelu defaults to the exact erf form; tanh
    # approximation is used because erf lowering on Mosaic is not guaranteed.
    c = jnp.float32(0.7978845608028654)  # sqrt(2/pi)
    return 0.5 * x * (1.0 + jnp.tanh(c * (x + 0.044715 * x * x * x)))


def _layer_norm(x, gamma, beta):
    mu = jnp.mean(x, axis=-1, keepdims=True)
    var = jnp.mean((x - mu) ** 2, axis=-1, keepdims=True)
    return (x - mu) * lax.rsqrt(var + LN_EPS) * gamma + beta


# ----------------------------------------------------------------------------
# Fused kernel: whole GAT forward for a block of Bt batch elements per step.
# ----------------------------------------------------------------------------
def gat_fused_kernel(x_ref, adj_ref,
                     w1_ref, a1_ref, a2_ref,        # stacked-head W, block-diag a
                     w2_ref, ao1_ref,               # out_att W (per-head split), a[:O]
                     wfc_ref, vecs_ref,             # fc W, packed small vectors
                     o_ref, *, nheads, nhid, bt, mxu_dtype):
    N = x_ref.shape[1]
    Fin = x_ref.shape[2]
    H = nheads * nhid

    x = x_ref[...]                                   # [Bt, N, Fin] f32 (residual too)
    w1 = w1_ref[...]                                 # [Fin, H]   (already mxu_dtype)
    a1 = a1_ref[...]                                 # [H, nheads] f32, block-diag
    a2 = a2_ref[...]                                 # [nheads, H] f32, block-diag
    ao1 = ao1_ref[...]                               # [nhid, 1]  f32
    wfc = wfc_ref[...]                               # [nhid, nhid] (already mxu_dtype)
    vecs = vecs_ref[...]                             # [K, nhid]  f32 packed vectors
    base = 2 * nheads                                # row offsets into vecs
    neg = jnp.float32(-9e15)

    # --- batched Wh for all heads & all batch elems in the block (>= Bt*N rows) --
    x_flat = x.reshape(bt * N, Fin)
    wh_flat = jnp.dot(x_flat.astype(mxu_dtype), w1,
                      preferred_element_type=jnp.float32)            # [Bt*N, H]
    # Rank-1 logit "query" part for ALL heads in one block-diagonal matmul.
    f1_flat = jnp.dot(wh_flat, a1, preferred_element_type=jnp.float32)  # [Bt*N, nheads]
    wh_all = wh_flat.reshape(bt, N, H)
    f1_all = f1_flat.reshape(bt, N, nheads)

    for b in range(bt):                               # static unroll over block
        xb = x[b]                                     # [N, Fin]
        mask = adj_ref[b].astype(jnp.float32) > 0.0   # computed once, reused 3x
        wh_b = wh_all[b]                              # [N, H]
        # "key" part of the logits for all heads of this batch element: [nheads, N]
        f2_b = lax.dot_general(a2, wh_b, (((1,), (1,)), ((), ())),
                               preferred_element_type=jnp.float32)

        def attn(f1_col, f2_row, wh_head, gamma, beta):
            e = f1_col + f2_row                        # [N, N] rank-1 broadcast
            e = jnp.where(e > 0, e, ALPHA * e)         # LeakyReLU
            s = jnp.where(mask, e, neg)                # adjacency mask
            s = s - jnp.max(s, axis=-1, keepdims=True)
            p = jnp.exp(s)
            att = p * pl.reciprocal(jnp.sum(p, axis=-1, keepdims=True), approx=True)
            hp = jnp.dot(att.astype(mxu_dtype), wh_head.astype(mxu_dtype),
                         preferred_element_type=jnp.float32)          # [N, nhid]
            return _layer_norm(hp, gamma, beta)

        # --- nheads concat heads, accumulated straight into out_att's Wh --------
        wh2 = jnp.zeros((N, nhid), jnp.float32)
        for h in range(nheads):
            wh_h = wh_b[:, h * nhid:(h + 1) * nhid]
            hp = attn(f1_all[b][:, h:h + 1], f2_b[h:h + 1, :], wh_h,
                      vecs[h:h + 1, :], vecs[nheads + h:nheads + h + 1, :])
            hp = _gelu(hp)                             # concat=True head output
            # replaces the lane-dim concat: xcat @ W2 == sum_h head_h @ W2[h]
            wh2 = wh2 + jnp.dot(hp.astype(mxu_dtype), w2_ref[h],
                                preferred_element_type=jnp.float32)

        # --- out_att layer (concat=False, no GELU inside) -----------------------
        f1o = jnp.dot(wh2, ao1, preferred_element_type=jnp.float32)   # [N, 1]
        f2o = lax.dot_general(vecs[base:base + 1, :], wh2,
                              (((1,), (1,)), ((), ())),
                              preferred_element_type=jnp.float32)     # [1, N]
        y = attn(f1o, f2o, wh2,
                 vecs[base + 1:base + 2, :], vecs[base + 2:base + 3, :])

        # --- gelu -> fc -> + residual -> LayerNorm -------------------------------
        z = jnp.dot(_gelu(y).astype(mxu_dtype), wfc,
                    preferred_element_type=jnp.float32)
        z = z + vecs[base + 3:base + 4, :] + xb        # fc bias + residual
        o_ref[b] = _layer_norm(z, vecs[base + 4:base + 5, :],
                               vecs[base + 5:base + 6, :]).astype(o_ref.dtype)


# ----------------------------------------------------------------------------
# Wrapper: pack params, pick batch block, single pallas_call over grid=(B//Bt,)
# ----------------------------------------------------------------------------
def _pick_bt(B, bt):
    if bt is not None:
        assert B % bt == 0, "bt must divide the batch size"
        return bt
    if B <= 1:
        return max(B, 1)
    # keep >= 2 grid steps so DMA/compute overlap and both v7x TCs get work
    for cand in range(B // 2, 0, -1):
        if B % cand == 0:
            return cand
    return 1


def gat_forward(params, x, adj, *, mxu_dtype=jnp.float32, bt=None):
    """Full GAT forward (inference; dropout = identity).

    mxu_dtype=jnp.bfloat16 halves MXU-operand / weight-DMA bytes (legal on all
    TPU generations for the MXU); f32 accumulation is kept everywhere.
    """
    B, N, Fin = x.shape
    attn = params["attentions"]
    nheads = len(attn)
    nhid = attn[0]["W"].shape[1]
    H = nheads * nhid
    assert Fin == nhid, "residual add (fc(x) + res) requires nfeat == nhid"

    # Stacked head projection (one Wh matmul for all heads), pre-cast once.
    W1 = jnp.concatenate([p["W"] for p in attn], axis=1).astype(mxu_dtype)  # [Fin, H]

    # Block-diagonal attention vectors: F1 = Wh_all @ A1, F2 = A2 @ Wh_all^T.
    A1 = jnp.zeros((H, nheads), jnp.float32)
    A2 = jnp.zeros((nheads, H), jnp.float32)
    for h, p in enumerate(attn):
        A1 = A1.at[h * nhid:(h + 1) * nhid, h].set(p["a"][:nhid, 0])
        A2 = A2.at[h, h * nhid:(h + 1) * nhid].set(p["a"][nhid:, 0])

    po = params["out_att"]
    W2s = po["W"].reshape(nheads, nhid, nhid).astype(mxu_dtype)   # per-head split
    a_o1 = po["a"][:nhid].astype(jnp.float32)                     # [nhid, 1]
    fcW = params["fc_W"].astype(mxu_dtype)                        # [nhid, nhid]

    # Pack all tiny [nhid]-vectors into one array (fewer inputs / DMAs):
    #   rows 0..nheads-1: head LN gamma | nheads..2*nheads-1: head LN beta
    #   then: out_att a[O:], out_att LN gamma, out_att LN beta, fc bias,
    #         final LN gamma, final LN beta
    vec_rows = ([p["ln_g"] for p in attn] + [p["ln_b"] for p in attn] +
                [po["a"][nhid:, 0], po["ln_g"], po["ln_b"],
                 params["fc_b"], params["ln_g"], params["ln_b"]])
    vecs = jnp.stack([r.reshape(nhid) for r in vec_rows], axis=0).astype(jnp.float32)
    K = vecs.shape[0]

    # Adjacency as an int8 mask: 4x less DMA / VMEM than f32.
    adj_i8 = (adj > 0).astype(jnp.int8)

    bt_val = _pick_bt(B, bt)
    grid = (B // bt_val,)

    # ---- VMEM budget (no double counting of double-buffering) -----------------
    fp = 4
    w_bytes = (W1.size * W1.dtype.itemsize + W2s.size * W2s.dtype.itemsize +
               fcW.size * fcW.dtype.itemsize +
               fp * (A1.size + A2.size + a_o1.size + vecs.size))
    stream_bytes = 2 * (fp * bt_val * N * Fin          # x, double-buffered
                        + bt_val * N * N               # adj (int8), double-buffered
                        + fp * bt_val * N * nhid)      # out, double-buffered
    tmp_bytes = fp * (bt_val * N * H + bt_val * N * nheads
                      + 6 * N * N + 10 * N * nhid)     # logits chain + head temps
    need = 2 * w_bytes + stream_bytes + tmp_bytes + (4 << 20)   # + Mosaic scratch
    try:
        phys = getattr(pltpu.get_tpu_info(), "vmem_capacity_bytes", 64 << 20)
    except Exception:  # pragma: no cover - defensive fallback
        phys = 64 << 20
    cap = min(100 << 20, int(phys * 0.8))              # 64 MiB/TC on v7x, 128 MiB else
    vmem_limit = int(min(max(need, 16 << 20), cap))

    kernel = functools.partial(gat_fused_kernel, nheads=nheads, nhid=nhid,
                               bt=bt_val, mxu_dtype=mxu_dtype)
    blk3 = lambda i: (i, 0, 0)
    c2 = lambda i: (0, 0)
    c3 = lambda i: (0, 0, 0)

    return pl.pallas_call(
        kernel,
        out_shape=jax.ShapeDtypeStruct((B, N, nhid), x.dtype),
        grid_spec=pltpu.PrefetchScalarGridSpec(
            num_scalar_prefetch=0,
            grid=grid,
            in_specs=[
                pl.BlockSpec((bt_val, N, Fin), blk3),   # x (also the residual)
                pl.BlockSpec((bt_val, N, N), blk3),     # adjacency mask (int8)
                pl.BlockSpec((Fin, H), c2),             # stacked head W
                pl.BlockSpec((H, nheads), c2),          # block-diag a[:O] (all heads)
                pl.BlockSpec((nheads, H), c2),          # block-diag a[O:] (all heads)
                pl.BlockSpec((nheads, nhid, nhid), c3), # out_att W, split per head
                pl.BlockSpec((nhid, 1), c2),            # out_att a[:O]
                pl.BlockSpec((nhid, nhid), c2),         # fc W (pre-transposed)
                pl.BlockSpec((K, nhid), c2),            # packed small vectors
            ],
            out_specs=pl.BlockSpec((bt_val, N, nhid), blk3),
        ),
        compiler_params=pltpu.CompilerParams(
            dimension_semantics=("parallel",),          # shards across v7x's 2 TCs
            vmem_limit_bytes=vmem_limit),
    )(x, adj_i8, W1, A1, A2, W2s, a_o1, fcW, vecs)


# ----------------------------------------------------------------------------
# Deterministic parameter init (mirrors torch init schemes in scale)
# ----------------------------------------------------------------------------
def init_gat_layer_params(key, in_f, out_f):
    k1, k2 = jax.random.split(key)
    bound_w = 1.414 * (6.0 / (in_f + out_f)) ** 0.5          # xavier_uniform gain=1.414
    W = jax.random.uniform(k1, (in_f, out_f), jnp.float32, -bound_w, bound_w)
    fan_in = 2 * out_f
    gain = (2.0 / (1.0 + ALPHA ** 2)) ** 0.5                 # kaiming_uniform(leaky_relu)
    bound_a = gain * (3.0 / fan_in) ** 0.5
    a = jax.random.uniform(k2, (2 * out_f, 1), jnp.float32, -bound_a, bound_a)
    return {
        "W": W,
        "a": a,
        "ln_g": jnp.ones((out_f,), jnp.float32),
        "ln_b": jnp.zeros((out_f,), jnp.float32),
    }


def init_gat_params(key, nfeat, nhid, nheads):
    keys = jax.random.split(key, nheads + 3)
    attn = [init_gat_layer_params(keys[i], nfeat, nhid) for i in range(nheads)]
    out_att = init_gat_layer_params(keys[nheads], nhid * nheads, nhid)
    bound_fc = 1.0 / (nhid ** 0.5)
    fc_W = jax.random.uniform(keys[nheads + 1], (nhid, nhid), jnp.float32,
                              -bound_fc, bound_fc)
    fc_b = jax.random.uniform(keys[nheads + 2], (nhid,), jnp.float32,
                              -bound_fc, bound_fc)
    return {
        "attentions": attn,
        "out_att": out_att,
        "fc_W": fc_W,
        "fc_b": fc_b,
        "ln_g": jnp.ones((nhid,), jnp.float32),
        "ln_b": jnp.zeros((nhid,), jnp.float32),
    }


if __name__ == "__main__":
    B, N = 2, 8
    nfeat = nhid = 32          # residual (x + res) requires nfeat == nhid
    nheads = 2

    key = jax.random.PRNGKey(0)
    kx, kadj, kp = jax.random.split(key, 3)

    x = jax.random.normal(kx, (B, N, nfeat), dtype=jnp.float32)
    adj = (jax.random.uniform(kadj, (B, N, N)) > 0.5).astype(jnp.float32)
    adj = jnp.maximum(adj, jnp.eye(N, dtype=jnp.float32)[None])  # self loops

    params = init_gat_params(kp, nfeat, nhid, nheads)

    out = gat_forward(params, x, adj)
    jax.block_until_ready(out)
    assert out.shape == (B, N, nhid)
    print("KERNEL_OK")
</pallas_src>

<mosaic_0001>
module attributes {stable_mosaic.version = 11 : i64} {
  func.func @gat_fused_kernel(%arg0: i32, %arg1: memref<1x8x32xf32, #tpu.memory_space<vmem>>, %arg2: memref<1x8x8xi8, #tpu.memory_space<vmem>>, %arg3: memref<32x64xf32, #tpu.memory_space<vmem>>, %arg4: memref<64x2xf32, #tpu.memory_space<vmem>>, %arg5: memref<2x64xf32, #tpu.memory_space<vmem>>, %arg6: memref<2x32x32xf32, #tpu.memory_space<vmem>>, %arg7: memref<32x1xf32, #tpu.memory_space<vmem>>, %arg8: memref<32x32xf32, #tpu.memory_space<vmem>>, %arg9: memref<10x32xf32, #tpu.memory_space<vmem>>, %arg10: memref<1x8x32xf32, #tpu.memory_space<vmem>>) attributes {dimension_semantics = [#tpu.dimension_semantics<parallel>], iteration_bounds = array<i64: 2>, scalar_prefetch = 0 : i64, scratch_operands = 0 : i64, tpu.core_type = #tpu.core_type<tc>, window_params = [{transform_indices = @transform_0, window_bounds = array<i64: 1, 8, 32>}, {transform_indices = @transform_1, window_bounds = array<i64: 1, 8, 8>}, {pipeline_mode = #tpu.pipeline_mode<synchronous>, transform_indices = @transform_2, window_bounds = array<i64: 32, 64>}, {pipeline_mode = #tpu.pipeline_mode<synchronous>, transform_indices = @transform_3, window_bounds = array<i64: 64, 2>}, {pipeline_mode = #tpu.pipeline_mode<synchronous>, transform_indices = @transform_4, window_bounds = array<i64: 2, 64>}, {pipeline_mode = #tpu.pipeline_mode<synchronous>, transform_indices = @transform_5, window_bounds = array<i64: 2, 32, 32>}, {pipeline_mode = #tpu.pipeline_mode<synchronous>, transform_indices = @transform_6, window_bounds = array<i64: 32, 1>}, {pipeline_mode = #tpu.pipeline_mode<synchronous>, transform_indices = @transform_7, window_bounds = array<i64: 32, 32>}, {pipeline_mode = #tpu.pipeline_mode<synchronous>, transform_indices = @transform_8, window_bounds = array<i64: 10, 32>}, {transform_indices = @transform_9, window_bounds = array<i64: 1, 8, 32>}]} {
    %c0 = arith.constant 0 : index
    %c0_0 = arith.constant 0 : index
    %c0_1 = arith.constant 0 : index
    %0 = vector.load %arg1[%c0, %c0_0, %c0_1] : memref<1x8x32xf32, #tpu.memory_space<vmem>>, vector<1x8x32xf32>
    %c0_2 = arith.constant 0 : index
    %c0_3 = arith.constant 0 : index
    %1 = vector.load %arg3[%c0_2, %c0_3] : memref<32x64xf32, #tpu.memory_space<vmem>>, vector<32x64xf32>
    %c0_4 = arith.constant 0 : index
    %c0_5 = arith.constant 0 : index
    %2 = vector.load %arg4[%c0_4, %c0_5] : memref<64x2xf32, #tpu.memory_space<vmem>>, vector<64x2xf32>
    %c0_6 = arith.constant 0 : index
    %c0_7 = arith.constant 0 : index
    %3 = vector.load %arg5[%c0_6, %c0_7] : memref<2x64xf32, #tpu.memory_space<vmem>>, vector<2x64xf32>
    %c0_8 = arith.constant 0 : index
    %c0_9 = arith.constant 0 : index
    %4 = vector.load %arg7[%c0_8, %c0_9] : memref<32x1xf32, #tpu.memory_space<vmem>>, vector<32x1xf32>
    %c0_10 = arith.constant 0 : index
    %c0_11 = arith.constant 0 : index
    %5 = vector.load %arg8[%c0_10, %c0_11] : memref<32x32xf32, #tpu.memory_space<vmem>>, vector<32x32xf32>
    %c0_12 = arith.constant 0 : index
    %c0_13 = arith.constant 0 : index
    %6 = vector.load %arg9[%c0_12, %c0_13] : memref<10x32xf32, #tpu.memory_space<vmem>>, vector<10x32xf32>
    %7 = vector.shape_cast %0 : vector<1x8x32xf32> to vector<8x32xf32>
    %cst = arith.constant dense<0.000000e+00> : vector<8x64xf32>
    %8 = tpu.matmul %7, %1, %cst {dimension_numbers = #tpu.dot_dimension_numbers<[1], [0], [0], [1], [0, 0, 1, 1], [], []>} : vector<8x32xf32>, vector<32x64xf32>, vector<8x64xf32> -> vector<8x64xf32>
    %cst_14 = arith.constant dense<0.000000e+00> : vector<8x2xf32>
    %9 = tpu.matmul %8, %2, %cst_14 {dimension_numbers = #tpu.dot_dimension_numbers<[1], [0], [0], [1], [0, 0, 1, 1], [], []>} : vector<8x64xf32>, vector<64x2xf32>, vector<8x2xf32> -> vector<8x2xf32>
    %10 = vector.shape_cast %8 : vector<8x64xf32> to vector<1x8x64xf32>
    %11 = vector.shape_cast %9 : vector<8x2xf32> to vector<1x8x2xf32>
    %12 = vector.shape_cast %0 : vector<1x8x32xf32> to vector<8x32xf32>
    %c0_15 = arith.constant 0 : index
    %c0_16 = arith.constant 0 : index
    %c0_17 = arith.constant 0 : index
    %13 = vector.load %arg2[%c0_15, %c0_16, %c0_17] : memref<1x8x8xi8, #tpu.memory_space<vmem>>, vector<1x8x8xi8>
    %14 = vector.shape_cast %13 : vector<1x8x8xi8> to vector<8x8xi8>
    %15 = arith.sitofp %14 : vector<8x8xi8> to vector<8x8xf32>
    %cst_18 = arith.constant 0.000000e+00 : f32
    %16 = vector.broadcast %cst_18 : f32 to vector<8x8xf32>
    %17 = arith.cmpf ogt, %15, %16 : vector<8x8xf32>
    %18 = vector.shape_cast %10 : vector<1x8x64xf32> to vector<8x64xf32>
    %cst_19 = arith.constant dense<0.000000e+00> : vector<2x8xf32>
    %19 = tpu.matmul %3, %18, %cst_19 {dimension_numbers = #tpu.dot_dimension_numbers<[1], [1], [0], [0], [0, 0, 1, 0], [], []>} : vector<2x64xf32>, vector<8x64xf32>, vector<2x8xf32> -> vector<2x8xf32>
    %cst_20 = arith.constant 0.000000e+00 : f32
    %20 = vector.broadcast %cst_20 : f32 to vector<8x32xf32>
    %21 = vector.extract_strided_slice %18 {offsets = [0, 0], sizes = [8, 32], strides = [1, 1]} : vector<8x64xf32> to vector<8x32xf32>
    %22 = vector.shape_cast %11 : vector<1x8x2xf32> to vector<8x2xf32>
    %23 = vector.extract_strided_slice %22 {offsets = [0, 0], sizes = [8, 1], strides = [1, 1]} : vector<8x2xf32> to vector<8x1xf32>
    %24 = vector.extract_strided_slice %19 {offsets = [0, 0], sizes = [1, 8], strides = [1, 1]} : vector<2x8xf32> to vector<1x8xf32>
    %25 = vector.extract_strided_slice %6 {offsets = [0, 0], sizes = [1, 32], strides = [1, 1]} : vector<10x32xf32> to vector<1x32xf32>
    %26 = vector.extract_strided_slice %6 {offsets = [2, 0], sizes = [1, 32], strides = [1, 1]} : vector<10x32xf32> to vector<1x32xf32>
    %27 = vector.broadcast %23 : vector<8x1xf32> to vector<8x8xf32>
    %28 = vector.broadcast %24 : vector<1x8xf32> to vector<8x8xf32>
    %29 = arith.addf %27, %28 : vector<8x8xf32>
    %cst_21 = arith.constant 0.000000e+00 : f32
    %30 = vector.broadcast %cst_21 : f32 to vector<8x8xf32>
    %31 = arith.cmpf ogt, %29, %30 : vector<8x8xf32>
    %cst_22 = arith.constant 2.000000e-02 : f32
    %32 = vector.broadcast %cst_22 : f32 to vector<8x8xf32>
    %33 = arith.mulf %32, %29 : vector<8x8xf32>
    %34 = arith.select %31, %29, %33 : vector<8x8xi1>, vector<8x8xf32>
    %cst_23 = arith.constant -9.000000e+15 : f32
    %35 = vector.broadcast %cst_23 : f32 to vector<8x8xf32>
    %36 = arith.select %17, %34, %35 : vector<8x8xi1>, vector<8x8xf32>
    %cst_24 = arith.constant dense<0xFF800000> : vector<8xf32>
    %37 = vector.multi_reduction <maximumf>, %36, %cst_24 [1] : vector<8x8xf32> to vector<8xf32>
    %38 = vector.shape_cast %37 : vector<8xf32> to vector<8x1xf32>
    %39 = vector.broadcast %38 : vector<8x1xf32> to vector<8x8xf32>
    %40 = arith.subf %36, %39 : vector<8x8xf32>
    %41 = math.exp %40 : vector<8x8xf32>
    %cst_25 = arith.constant dense<0.000000e+00> : vector<8xf32>
    %42 = vector.multi_reduction <add>, %41, %cst_25 [1] : vector<8x8xf32> to vector<8xf32>
    %43 = vector.shape_cast %42 : vector<8xf32> to vector<8x1xf32>
    %44 = tpu.reciprocal %43 {approx = true} : vector<8x1xf32> -> vector<8x1xf32>
    %45 = vector.broadcast %44 : vector<8x1xf32> to vector<8x8xf32>
    %46 = arith.mulf %41, %45 : vector<8x8xf32>
    %cst_26 = arith.constant dense<0.000000e+00> : vector<8x32xf32>
    %47 = tpu.matmul %46, %21, %cst_26 {dimension_numbers = #tpu.dot_dimension_numbers<[1], [0], [0], [1], [0, 0, 1, 1], [], []>} : vector<8x8xf32>, vector<8x32xf32>, vector<8x32xf32> -> vector<8x32xf32>
    %cst_27 = arith.constant dense<0.000000e+00> : vector<8xf32>
    %48 = vector.multi_reduction <add>, %47, %cst_27 [1] : vector<8x32xf32> to vector<8xf32>
    %49 = vector.shape_cast %48 : vector<8xf32> to vector<8x1xf32>
    %cst_28 = arith.constant 3.200000e+01 : f32
    %50 = vector.broadcast %cst_28 : f32 to vector<8x1xf32>
    %51 = arith.divf %49, %50 : vector<8x1xf32>
    %52 = vector.broadcast %51 : vector<8x1xf32> to vector<8x32xf32>
    %53 = arith.subf %47, %52 : vector<8x32xf32>
    %54 = arith.mulf %53, %53 : vector<8x32xf32>
    %cst_29 = arith.constant dense<0.000000e+00> : vector<8xf32>
    %55 = vector.multi_reduction <add>, %54, %cst_29 [1] : vector<8x32xf32> to vector<8xf32>
    %56 = vector.shape_cast %55 : vector<8xf32> to vector<8x1xf32>
    %cst_30 = arith.constant 3.200000e+01 : f32
    %57 = vector.broadcast %cst_30 : f32 to vector<8x1xf32>
    %58 = arith.divf %56, %57 : vector<8x1xf32>
    %59 = vector.broadcast %51 : vector<8x1xf32> to vector<8x32xf32>
    %60 = arith.subf %47, %59 : vector<8x32xf32>
    %cst_31 = arith.constant 9.99999974E-6 : f32
    %61 = vector.broadcast %cst_31 : f32 to vector<8x1xf32>
    %62 = arith.addf %58, %61 : vector<8x1xf32>
    %63 = math.rsqrt %62 : vector<8x1xf32>
    %64 = vector.broadcast %63 : vector<8x1xf32> to vector<8x32xf32>
    %65 = arith.mulf %60, %64 : vector<8x32xf32>
    %66 = vector.broadcast %25 : vector<1x32xf32> to vector<8x32xf32>
    %67 = arith.mulf %65, %66 : vector<8x32xf32>
    %68 = vector.broadcast %26 : vector<1x32xf32> to vector<8x32xf32>
    %69 = arith.addf %67, %68 : vector<8x32xf32>
    %cst_32 = arith.constant 5.000000e-01 : f32
    %70 = vector.broadcast %cst_32 : f32 to vector<8x32xf32>
    %71 = arith.mulf %70, %69 : vector<8x32xf32>
    %cst_33 = arith.constant 4.471500e-02 : f32
    %72 = vector.broadcast %cst_33 : f32 to vector<8x32xf32>
    %73 = arith.mulf %72, %69 : vector<8x32xf32>
    %74 = arith.mulf %73, %69 : vector<8x32xf32>
    %75 = arith.mulf %74, %69 : vector<8x32xf32>
    %76 = arith.addf %69, %75 : vector<8x32xf32>
    %cst_34 = arith.constant 0.797884583 : f32
    %77 = vector.broadcast %cst_34 : f32 to vector<8x32xf32>
    %78 = arith.mulf %77, %76 : vector<8x32xf32>
    %79 = math.tanh %78 : vector<8x32xf32>
    %cst_35 = arith.constant 1.000000e+00 : f32
    %80 = vector.broadcast %cst_35 : f32 to vector<8x32xf32>
    %81 = arith.addf %80, %79 : vector<8x32xf32>
    %82 = arith.mulf %71, %81 : vector<8x32xf32>
    %c0_36 = arith.constant 0 : index
    %c0_37 = arith.constant 0 : index
    %c0_38 = arith.constant 0 : index
    %83 = vector.load %arg6[%c0_36, %c0_37, %c0_38] : memref<2x32x32xf32, #tpu.memory_space<vmem>>, vector<1x32x32xf32>
    %84 = vector.shape_cast %83 : vector<1x32x32xf32> to vector<32x32xf32>
    %cst_39 = arith.constant dense<0.000000e+00> : vector<8x32xf32>
    %85 = tpu.matmul %82, %84, %cst_39 {dimension_numbers = #tpu.dot_dimension_numbers<[1], [0], [0], [1], [0, 0, 1, 1], [], []>} : vector<8x32xf32>, vector<32x32xf32>, vector<8x32xf32> -> vector<8x32xf32>
    %86 = arith.addf %20, %85 : vector<8x32xf32>
    %87 = vector.extract_strided_slice %18 {offsets = [0, 32], sizes = [8, 32], strides = [1, 1]} : vector<8x64xf32> to vector<8x32xf32>
    %88 = vector.shape_cast %11 : vector<1x8x2xf32> to vector<8x2xf32>
    %89 = vector.extract_strided_slice %88 {offsets = [0, 1], sizes = [8, 1], strides = [1, 1]} : vector<8x2xf32> to vector<8x1xf32>
    %90 = vector.extract_strided_slice %19 {offsets = [1, 0], sizes = [1, 8], strides = [1, 1]} : vector<2x8xf32> to vector<1x8xf32>
    %91 = vector.extract_strided_slice %6 {offsets = [1, 0], sizes = [1, 32], strides = [1, 1]} : vector<10x32xf32> to vector<1x32xf32>
    %92 = vector.extract_strided_slice %6 {offsets = [3, 0], sizes = [1, 32], strides = [1, 1]} : vector<10x32xf32> to vector<1x32xf32>
    %93 = vector.broadcast %89 : vector<8x1xf32> to vector<8x8xf32>
    %94 = vector.broadcast %90 : vector<1x8xf32> to vector<8x8xf32>
    %95 = arith.addf %93, %94 : vector<8x8xf32>
    %cst_40 = arith.constant 0.000000e+00 : f32
    %96 = vector.broadcast %cst_40 : f32 to vector<8x8xf32>
    %97 = arith.cmpf ogt, %95, %96 : vector<8x8xf32>
    %cst_41 = arith.constant 2.000000e-02 : f32
    %98 = vector.broadcast %cst_41 : f32 to vector<8x8xf32>
    %99 = arith.mulf %98, %95 : vector<8x8xf32>
    %100 = arith.select %97, %95, %99 : vector<8x8xi1>, vector<8x8xf32>
    %cst_42 = arith.constant -9.000000e+15 : f32
    %101 = vector.broadcast %cst_42 : f32 to vector<8x8xf32>
    %102 = arith.select %17, %100, %101 : vector<8x8xi1>, vector<8x8xf32>
    %cst_43 = arith.constant dense<0xFF800000> : vector<8xf32>
    %103 = vector.multi_reduction <maximumf>, %102, %cst_43 [1] : vector<8x8xf32> to vector<8xf32>
    %104 = vector.shape_cast %103 : vector<8xf32> to vector<8x1xf32>
    %105 = vector.broadcast %104 : vector<8x1xf32> to vector<8x8xf32>
    %106 = arith.subf %102, %105 : vector<8x8xf32>
    %107 = math.exp %106 : vector<8x8xf32>
    %cst_44 = arith.constant dense<0.000000e+00> : vector<8xf32>
    %108 = vector.multi_reduction <add>, %107, %cst_44 [1] : vector<8x8xf32> to vector<8xf32>
    %109 = vector.shape_cast %108 : vector<8xf32> to vector<8x1xf32>
    %110 = tpu.reciprocal %109 {approx = true} : vector<8x1xf32> -> vector<8x1xf32>
    %111 = vector.broadcast %110 : vector<8x1xf32> to vector<8x8xf32>
    %112 = arith.mulf %107, %111 : vector<8x8xf32>
    %cst_45 = arith.constant dense<0.000000e+00> : vector<8x32xf32>
    %113 = tpu.matmul %112, %87, %cst_45 {dimension_numbers = #tpu.dot_dimension_numbers<[1], [0], [0], [1], [0, 0, 1, 1], [], []>} : vector<8x8xf32>, vector<8x32xf32>, vector<8x32xf32> -> vector<8x32xf32>
    %cst_46 = arith.constant dense<0.000000e+00> : vector<8xf32>
    %114 = vector.multi_reduction <add>, %113, %cst_46 [1] : vector<8x32xf32> to vector<8xf32>
    %115 = vector.shape_cast %114 : vector<8xf32> to vector<8x1xf32>
    %cst_47 = arith.constant 3.200000e+01 : f32
    %116 = vector.broadcast %cst_47 : f32 to vector<8x1xf32>
    %117 = arith.divf %115, %116 : vector<8x1xf32>
    %118 = vector.broadcast %117 : vector<8x1xf32> to vector<8x32xf32>
    %119 = arith.subf %113, %118 : vector<8x32xf32>
    %120 = arith.mulf %119, %119 : vector<8x32xf32>
    %cst_48 = arith.constant dense<0.000000e+00> : vector<8xf32>
    %121 = vector.multi_reduction <add>, %120, %cst_48 [1] : vector<8x32xf32> to vector<8xf32>
    %122 = vector.shape_cast %121 : vector<8xf32> to vector<8x1xf32>
    %cst_49 = arith.constant 3.200000e+01 : f32
    %123 = vector.broadcast %cst_49 : f32 to vector<8x1xf32>
    %124 = arith.divf %122, %123 : vector<8x1xf32>
    %125 = vector.broadcast %117 : vector<8x1xf32> to vector<8x32xf32>
    %126 = arith.subf %113, %125 : vector<8x32xf32>
    %cst_50 = arith.constant 9.99999974E-6 : f32
    %127 = vector.broadcast %cst_50 : f32 to vector<8x1xf32>
    %128 = arith.addf %124, %127 : vector<8x1xf32>
    %129 = math.rsqrt %128 : vector<8x1xf32>
    %130 = vector.broadcast %129 : vector<8x1xf32> to vector<8x32xf32>
    %131 = arith.mulf %126, %130 : vector<8x32xf32>
    %132 = vector.broadcast %91 : vector<1x32xf32> to vector<8x32xf32>
    %133 = arith.mulf %131, %132 : vector<8x32xf32>
    %134 = vector.broadcast %92 : vector<1x32xf32> to vector<8x32xf32>
    %135 = arith.addf %133, %134 : vector<8x32xf32>
    %cst_51 = arith.constant 5.000000e-01 : f32
    %136 = vector.broadcast %cst_51 : f32 to vector<8x32xf32>
    %137 = arith.mulf %136, %135 : vector<8x32xf32>
    %cst_52 = arith.constant 4.471500e-02 : f32
    %138 = vector.broadcast %cst_52 : f32 to vector<8x32xf32>
    %139 = arith.mulf %138, %135 : vector<8x32xf32>
    %140 = arith.mulf %139, %135 : vector<8x32xf32>
    %141 = arith.mulf %140, %135 : vector<8x32xf32>
    %142 = arith.addf %135, %141 : vector<8x32xf32>
    %cst_53 = arith.constant 0.797884583 : f32
    %143 = vector.broadcast %cst_53 : f32 to vector<8x32xf32>
    %144 = arith.mulf %143, %142 : vector<8x32xf32>
    %145 = math.tanh %144 : vector<8x32xf32>
    %cst_54 = arith.constant 1.000000e+00 : f32
    %146 = vector.broadcast %cst_54 : f32 to vector<8x32xf32>
    %147 = arith.addf %146, %145 : vector<8x32xf32>
    %148 = arith.mulf %137, %147 : vector<8x32xf32>
    %c1 = arith.constant 1 : index
    %c0_55 = arith.constant 0 : index
    %c0_56 = arith.constant 0 : index
    %149 = vector.load %arg6[%c1, %c0_55, %c0_56] : memref<2x32x32xf32, #tpu.memory_space<vmem>>, vector<1x32x32xf32>
    %150 = vector.shape_cast %149 : vector<1x32x32xf32> to vector<32x32xf32>
    %cst_57 = arith.constant dense<0.000000e+00> : vector<8x32xf32>
    %151 = tpu.matmul %148, %150, %cst_57 {dimension_numbers = #tpu.dot_dimension_numbers<[1], [0], [0], [1], [0, 0, 1, 1], [], []>} : vector<8x32xf32>, vector<32x32xf32>, vector<8x32xf32> -> vector<8x32xf32>
    %152 = arith.addf %86, %151 : vector<8x32xf32>
    %cst_58 = arith.constant dense<0.000000e+00> : vector<8x1xf32>
    %153 = tpu.matmul %152, %4, %cst_58 {dimension_numbers = #tpu.dot_dimension_numbers<[1], [0], [0], [1], [0, 0, 1, 1], [], []>} : vector<8x32xf32>, vector<32x1xf32>, vector<8x1xf32> -> vector<8x1xf32>
    %154 = vector.extract_strided_slice %6 {offsets = [4, 0], sizes = [1, 32], strides = [1, 1]} : vector<10x32xf32> to vector<1x32xf32>
    %cst_59 = arith.constant dense<0.000000e+00> : vector<1x8xf32>
    %155 = tpu.matmul %154, %152, %cst_59 {dimension_numbers = #tpu.dot_dimension_numbers<[1], [1], [0], [0], [0, 0, 1, 0], [], []>} : vector<1x32xf32>, vector<8x32xf32>, vector<1x8xf32> -> vector<1x8xf32>
    %156 = vector.extract_strided_slice %6 {offsets = [5, 0], sizes = [1, 32], strides = [1, 1]} : vector<10x32xf32> to vector<1x32xf32>
    %157 = vector.extract_strided_slice %6 {offsets = [6, 0], sizes = [1, 32], strides = [1, 1]} : vector<10x32xf32> to vector<1x32xf32>
    %158 = vector.broadcast %153 : vector<8x1xf32> to vector<8x8xf32>
    %159 = vector.broadcast %155 : vector<1x8xf32> to vector<8x8xf32>
    %160 = arith.addf %158, %159 : vector<8x8xf32>
    %cst_60 = arith.constant 0.000000e+00 : f32
    %161 = vector.broadcast %cst_60 : f32 to vector<8x8xf32>
    %162 = arith.cmpf ogt, %160, %161 : vector<8x8xf32>
    %cst_61 = arith.constant 2.000000e-02 : f32
    %163 = vector.broadcast %cst_61 : f32 to vector<8x8xf32>
    %164 = arith.mulf %163, %160 : vector<8x8xf32>
    %165 = arith.select %162, %160, %164 : vector<8x8xi1>, vector<8x8xf32>
    %cst_62 = arith.constant -9.000000e+15 : f32
    %166 = vector.broadcast %cst_62 : f32 to vector<8x8xf32>
    %167 = arith.select %17, %165, %166 : vector<8x8xi1>, vector<8x8xf32>
    %cst_63 = arith.constant dense<0xFF800000> : vector<8xf32>
    %168 = vector.multi_reduction <maximumf>, %167, %cst_63 [1] : vector<8x8xf32> to vector<8xf32>
    %169 = vector.shape_cast %168 : vector<8xf32> to vector<8x1xf32>
    %170 = vector.broadcast %169 : vector<8x1xf32> to vector<8x8xf32>
    %171 = arith.subf %167, %170 : vector<8x8xf32>
    %172 = math.exp %171 : vector<8x8xf32>
    %cst_64 = arith.constant dense<0.000000e+00> : vector<8xf32>
    %173 = vector.multi_reduction <add>, %172, %cst_64 [1] : vector<8x8xf32> to vector<8xf32>
    %174 = vector.shape_cast %173 : vector<8xf32> to vector<8x1xf32>
    %175 = tpu.reciprocal %174 {approx = true} : vector<8x1xf32> -> vector<8x1xf32>
    %176 = vector.broadcast %175 : vector<8x1xf32> to vector<8x8xf32>
    %177 = arith.mulf %172, %176 : vector<8x8xf32>
    %cst_65 = arith.constant dense<0.000000e+00> : vector<8x32xf32>
    %178 = tpu.matmul %177, %152, %cst_65 {dimension_numbers = #tpu.dot_dimension_numbers<[1], [0], [0], [1], [0, 0, 1, 1], [], []>} : vector<8x8xf32>, vector<8x32xf32>, vector<8x32xf32> -> vector<8x32xf32>
    %cst_66 = arith.constant dense<0.000000e+00> : vector<8xf32>
    %179 = vector.multi_reduction <add>, %178, %cst_66 [1] : vector<8x32xf32> to vector<8xf32>
    %180 = vector.shape_cast %179 : vector<8xf32> to vector<8x1xf32>
    %cst_67 = arith.constant 3.200000e+01 : f32
    %181 = vector.broadcast %cst_67 : f32 to vector<8x1xf32>
    %182 = arith.divf %180, %181 : vector<8x1xf32>
    %183 = vector.broadcast %182 : vector<8x1xf32> to vector<8x32xf32>
    %184 = arith.subf %178, %183 : vector<8x32xf32>
    %185 = arith.mulf %184, %184 : vector<8x32xf32>
    %cst_68 = arith.constant dense<0.000000e+00> : vector<8xf32>
    %186 = vector.multi_reduction <add>, %185, %cst_68 [1] : vector<8x32xf32> to vector<8xf32>
    %187 = vector.shape_cast %186 : vector<8xf32> to vector<8x1xf32>
    %cst_69 = arith.constant 3.200000e+01 : f32
    %188 = vector.broadcast %cst_69 : f32 to vector<8x1xf32>
    %189 = arith.divf %187, %188 : vector<8x1xf32>
    %190 = vector.broadcast %182 : vector<8x1xf32> to vector<8x32xf32>
    %191 = arith.subf %178, %190 : vector<8x32xf32>
    %cst_70 = arith.constant 9.99999974E-6 : f32
    %192 = vector.broadcast %cst_70 : f32 to vector<8x1xf32>
    %193 = arith.addf %189, %192 : vector<8x1xf32>
    %194 = math.rsqrt %193 : vector<8x1xf32>
    %195 = vector.broadcast %194 : vector<8x1xf32> to vector<8x32xf32>
    %196 = arith.mulf %191, %195 : vector<8x32xf32>
    %197 = vector.broadcast %156 : vector<1x32xf32> to vector<8x32xf32>
    %198 = arith.mulf %196, %197 : vector<8x32xf32>
    %199 = vector.broadcast %157 : vector<1x32xf32> to vector<8x32xf32>
    %200 = arith.addf %198, %199 : vector<8x32xf32>
    %cst_71 = arith.constant 5.000000e-01 : f32
    %201 = vector.broadcast %cst_71 : f32 to vector<8x32xf32>
    %202 = arith.mulf %201, %200 : vector<8x32xf32>
    %cst_72 = arith.constant 4.471500e-02 : f32
    %203 = vector.broadcast %cst_72 : f32 to vector<8x32xf32>
    %204 = arith.mulf %203, %200 : vector<8x32xf32>
    %205 = arith.mulf %204, %200 : vector<8x32xf32>
    %206 = arith.mulf %205, %200 : vector<8x32xf32>
    %207 = arith.addf %200, %206 : vector<8x32xf32>
    %cst_73 = arith.constant 0.797884583 : f32
    %208 = vector.broadcast %cst_73 : f32 to vector<8x32xf32>
    %209 = arith.mulf %208, %207 : vector<8x32xf32>
    %210 = math.tanh %209 : vector<8x32xf32>
    %cst_74 = arith.constant 1.000000e+00 : f32
    %211 = vector.broadcast %cst_74 : f32 to vector<8x32xf32>
    %212 = arith.addf %211, %210 : vector<8x32xf32>
    %213 = arith.mulf %202, %212 : vector<8x32xf32>
    %cst_75 = arith.constant dense<0.000000e+00> : vector<8x32xf32>
    %214 = tpu.matmul %213, %5, %cst_75 {dimension_numbers = #tpu.dot_dimension_numbers<[1], [0], [0], [1], [0, 0, 1, 1], [], []>} : vector<8x32xf32>, vector<32x32xf32>, vector<8x32xf32> -> vector<8x32xf32>
    %215 = vector.extract_strided_slice %6 {offsets = [7, 0], sizes = [1, 32], strides = [1, 1]} : vector<10x32xf32> to vector<1x32xf32>
    %216 = vector.broadcast %215 : vector<1x32xf32> to vector<8x32xf32>
    %217 = arith.addf %214, %216 : vector<8x32xf32>
    %218 = arith.addf %217, %12 : vector<8x32xf32>
    %219 = vector.extract_strided_slice %6 {offsets = [8, 0], sizes = [1, 32], strides = [1, 1]} : vector<10x32xf32> to vector<1x32xf32>
    %220 = vector.extract_strided_slice %6 {offsets = [9, 0], sizes = [1, 32], strides = [1, 1]} : vector<10x32xf32> to vector<1x32xf32>
    %cst_76 = arith.constant dense<0.000000e+00> : vector<8xf32>
    %221 = vector.multi_reduction <add>, %218, %cst_76 [1] : vector<8x32xf32> to vector<8xf32>
    %222 = vector.shape_cast %221 : vector<8xf32> to vector<8x1xf32>
    %cst_77 = arith.constant 3.200000e+01 : f32
    %223 = vector.broadcast %cst_77 : f32 to vector<8x1xf32>
    %224 = arith.divf %222, %223 : vector<8x1xf32>
    %225 = vector.broadcast %224 : vector<8x1xf32> to vector<8x32xf32>
    %226 = arith.subf %218, %225 : vector<8x32xf32>
    %227 = arith.mulf %226, %226 : vector<8x32xf32>
    %cst_78 = arith.constant dense<0.000000e+00> : vector<8xf32>
    %228 = vector.multi_reduction <add>, %227, %cst_78 [1] : vector<8x32xf32> to vector<8xf32>
    %229 = vector.shape_cast %228 : vector<8xf32> to vector<8x1xf32>
    %cst_79 = arith.constant 3.200000e+01 : f32
    %230 = vector.broadcast %cst_79 : f32 to vector<8x1xf32>
    %231 = arith.divf %229, %230 : vector<8x1xf32>
    %232 = vector.broadcast %224 : vector<8x1xf32> to vector<8x32xf32>
    %233 = arith.subf %218, %232 : vector<8x32xf32>
    %cst_80 = arith.constant 9.99999974E-6 : f32
    %234 = vector.broadcast %cst_80 : f32 to vector<8x1xf32>
    %235 = arith.addf %231, %234 : vector<8x1xf32>
    %236 = math.rsqrt %235 : vector<8x1xf32>
    %237 = vector.broadcast %236 : vector<8x1xf32> to vector<8x32xf32>
    %238 = arith.mulf %233, %237 : vector<8x32xf32>
    %239 = vector.broadcast %219 : vector<1x32xf32> to vector<8x32xf32>
    %240 = arith.mulf %238, %239 : vector<8x32xf32>
    %241 = vector.broadcast %220 : vector<1x32xf32> to vector<8x32xf32>
    %242 = arith.addf %240, %241 : vector<8x32xf32>
    %c0_81 = arith.constant 0 : index
    %c0_82 = arith.constant 0 : index
    %c0_83 = arith.constant 0 : index
    %243 = vector.load %arg10[%c0_81, %c0_82, %c0_83] : memref<1x8x32xf32, #tpu.memory_space<vmem>>, vector<1x8x32xf32>
    %244 = vector.shape_cast %243 : vector<1x8x32xf32> to vector<8x32xf32>
    %245 = vector.shape_cast %242 : vector<8x32xf32> to vector<1x8x32xf32>
    tpu.vector_store %arg10[%c0_81, %c0_82, %c0_83], %245 {strides = array<i32>} : memref<1x8x32xf32, #tpu.memory_space<vmem>>, vector<1x8x32xf32>,
    return
  }
  func.func @transform_0(%arg0: i32) -> (i32, i32, i32) {
    %c0_i32 = arith.constant 0 : i32
    %c0_i32_0 = arith.constant 0 : i32
    %c0_i32_1 = arith.constant 0 : i32
    return %arg0, %c0_i32, %c0_i32_0 : i32, i32, i32
  }
  func.func @transform_1(%arg0: i32) -> (i32, i32, i32) {
    %c0_i32 = arith.constant 0 : i32
    %c0_i32_0 = arith.constant 0 : i32
    %c0_i32_1 = arith.constant 0 : i32
    return %arg0, %c0_i32, %c0_i32_0 : i32, i32, i32
  }
  func.func @transform_2(%arg0: i32) -> (i32, i32) {
    %c0_i32 = arith.constant 0 : i32
    %c0_i32_0 = arith.constant 0 : i32
    %c0_i32_1 = arith.constant 0 : i32
    return %c0_i32, %c0_i32_0 : i32, i32
  }
  func.func @transform_3(%arg0: i32) -> (i32, i32) {
    %c0_i32 = arith.constant 0 : i32
    %c0_i32_0 = arith.constant 0 : i32
    %c0_i32_1 = arith.constant 0 : i32
    return %c0_i32, %c0_i32_0 : i32, i32
  }
  func.func @transform_4(%arg0: i32) -> (i32, i32) {
    %c0_i32 = arith.constant 0 : i32
    %c0_i32_0 = arith.constant 0 : i32
    %c0_i32_1 = arith.constant 0 : i32
    return %c0_i32, %c0_i32_0 : i32, i32
  }
  func.func @transform_5(%arg0: i32) -> (i32, i32, i32) {
    %c0_i32 = arith.constant 0 : i32
    %c0_i32_0 = arith.constant 0 : i32
    %c0_i32_1 = arith.constant 0 : i32
    %c0_i32_2 = arith.constant 0 : i32
    return %c0_i32, %c0_i32_0, %c0_i32_1 : i32, i32, i32
  }
  func.func @transform_6(%arg0: i32) -> (i32, i32) {
    %c0_i32 = arith.constant 0 : i32
    %c0_i32_0 = arith.constant 0 : i32
    %c0_i32_1 = arith.constant 0 : i32
    return %c0_i32, %c0_i32_0 : i32, i32
  }
  func.func @transform_7(%arg0: i32) -> (i32, i32) {
    %c0_i32 = arith.constant 0 : i32
    %c0_i32_0 = arith.constant 0 : i32
    %c0_i32_1 = arith.constant 0 : i32
    return %c0_i32, %c0_i32_0 : i32, i32
  }
  func.func @transform_8(%arg0: i32) -> (i32, i32) {
    %c0_i32 = arith.constant 0 : i32
    %c0_i32_0 = arith.constant 0 : i32
    %c0_i32_1 = arith.constant 0 : i32
    return %c0_i32, %c0_i32_0 : i32, i32
  }
  func.func @transform_9(%arg0: i32) -> (i32, i32, i32) {
    %c0_i32 = arith.constant 0 : i32
    %c0_i32_0 = arith.constant 0 : i32
    %c0_i32_1 = arith.constant 0 : i32
    return %arg0, %c0_i32, %c0_i32_0 : i32, i32, i32
  }
}

</mosaic_0001>

<bundles_post_ra>
// kernel: tpu_custom_call.1
= control target key start
LH: loop header
LB: loop body
LE: loop exit
PB: predicated region body
PF: predicated region fallthrough
CT: control target
= control target key end

     0   :  { %s2552_s0 = inlined_call_operand.hbm [shape: f32[2,8,32], index: 0, kind: input, shape index: {}]   ;;  %s2553_s1 = inlined_call_operand.hbm [shape: s8[2,8,8], index: 1, kind: input, shape index: {}]   ;;  %s2554_s2 = inlined_call_operand.vmem [shape: f32[32,64], index: 2, kind: input, shape index: {}]   ;;  %s2555_s3 = inlined_call_operand.vmem [shape: f32[64,2], index: 3, kind: input, shape index: {}]   ;;  %s2556_s4 = inlined_call_operand.hbm [shape: f32[2,64], index: 4, kind: input, shape index: {}]   ;;  %s2557_s5 = inlined_call_operand.vmem [shape: f32[2,32,32], index: 5, kind: input, shape index: {}]   ;;  %s2558_s6 = inlined_call_operand.vmem [shape: f32[32,1], index: 6, kind: input, shape index: {}]   ;;  %s2559_s7 = inlined_call_operand.hbm [shape: f32[32,32], index: 7, kind: input, shape index: {}]   ;;  %s2560_s8 = inlined_call_operand.vmem [shape: f32[10,32], index: 8, kind: input, shape index: {}]   ;;  %s2561_s9 = inlined_call_operand.hbm [shape: f32[2,8,32], index: 9, kind: output, shape index: {}]  }
   0x1   :  { %2567 = sst [smem:[#allocation18_spill]] %s2552_s0 }
   0x2   :  { %2568 = sst [smem:[#allocation19_spill]] %s2556_s4 }
   0x3   :  { %2569 = sst [smem:[#allocation20_spill]] %s2559_s7 }
   0x4   :  { %14 = vsyncpa [#allocation3], 0 }
   0x5   :  { %16 = vsyncpa [#allocation3 + $0x1], 0 }
   0x6   :  { %17 = vsyncpa [#allocation6], 0 }
   0x7   :  { %19 = vsyncpa [#allocation6 + $0x1], 0 }
   0x8   :  { %20 = vsyncpa [#allocation9], 0 }
   0x9   :  { %21 = vsyncpa [#allocation4], 0 }
   0xa   :  { %23 = vsyncpa [#allocation4 + $0x1], 0  ;;  %s2120_s30 = smov 0   ;;  %s2122_s10 = smov 0  }
   0xb   :  { %s2124_s11 = smov 0   ;;  %s2126_s12 = smov 0  }
   0xc LB: > { %2570 = sst [smem:[#allocation16_spill]] %s2052_s11  ;;  %s2141_s13 = sadd.s32 4294967295, %s2056_s12   ;;  %s2056_s12 = sphi %s2126_s12, %s2597_s12   ;;  %s2052_s11 = sphi %s2124_s11, %s2594_s11   ;;  %s2048_s10 = sphi %s2122_s10, %s2596_s10   ;;  %s2044_s30 = sphi %s2120_s30, %s2595_s30  }
   0xd   : > { %s1585_s14 = sadd.s32 4294967294, %s2056_s12   ;;  %p49_p0 = scmp.ne.s32.totalorder %s2048_s10, %s2044_s30 }
   0xe   : > { %p2562_p1 = scmp.eq.s32.totalorder %s2141_s13, 0  ;;  %p252_p3 = scmp.eq.s32.totalorder %s1585_s14, 1 }
   0xf   : > { %p1586_p5 = scmp.ge.s32.totalorder %s2056_s12, 1  ;;  %p259_p7 = scmp.lt.s32.totalorder %s2056_s12, 3 }
  0x10   : > { %p2150_p4 = por %p2562_p1, %p49_p0  ;;  %p2155_p6 = por %p252_p3, %p49_p0 }
  0x11   : > { %p2160_p8 = pnand %p1586_p5, %p259_p7  ;;  %s2058_s18 = smov [#allocation7]  }
  0x12   : > { %s2571_s15 = scalar_select %p2150_p4, 1, 0 }
  0x13   : > { %s2572_s16 = scalar_select %p2155_p6, 1, 0 }
  0x14   : > { %s2573_s17 = scalar_select %p2160_p8, 1, 0 }
  0x15   : > { %s278_s19 = sshll.u32 %s2058_s18, 4  ;;  %p1778_p10 = pneg %p2160_p8  ;;  %s279_s19 = int_to_ptr.vmem [resolvable:$true] %s278_s19 }
  0x16   : > { %s2059_s20 = smov [#allocation8]   ;;  %s1883_s23 = scalar_lea.vmem %s279_s19, 32 }
  0x17   : > { %s294_s21 = sshll.u32 %s2059_s20, 4  ;;  %p2169_p11 = pnand %p1778_p10, %p2562_p1  ;;  %s295_s21 = int_to_ptr.vmem [resolvable:$true] %s294_s21 }
  0x18   : > { %p1884_p13 = scmp.ne.s32.totalorder %s279_s19, %s1883_s23  ;;  %p1891_p5 = scmp.lt.s32.totalorder %s279_s19, %s279_s19 }
  0x19   : > { %p1874_p12 = pneg %p2169_p11  ;;  %p1892_p7 = scmp.lt.s32.totalorder %s1883_s23, %s1883_s23 }
  0x1b   : > { %p1886_p0 = pnand %p1884_p13, %p1874_p12  ;;  %p1893_p9 = por %p1892_p7, %p1891_p5 }
  0x1d   : > { %p1887_p3 = pneg %p1886_p0 }
  0x1f   : > { %p1894_p2 = pnand %p1893_p9, %p1887_p3 }
  0x21   : > { %1897 = shalt.err (!%p1894_p2)
}
  0x22   : > { %s2575_s4 = sld [smem:[#allocation19_spill]]  ;;  %s1909_s26 = scalar_lea.vmem %s295_s21, 512 }
  0x23   : > { %p1910_p10 = scmp.ne.s32.totalorder %s295_s21, %s1909_s26  ;;  %p1917_p13 = scmp.lt.s32.totalorder %s295_s21, %s295_s21 }
  0x24   : > { %p1918_p0 = scmp.lt.s32.totalorder %s1909_s26, %s1909_s26 }
  0x25   : > { %p1912_p1 = pnand %p1910_p10, %p1874_p12 }
  0x26   : > { %p1919_p4 = por %p1918_p0, %p1917_p13 }
  0x27   : > { %p1913_p6 = pneg %p1912_p1 }
  0x28   : > { %1781 = dma.hbm_to_vmem [thread:$0]  (!%p2169_p11), %s2575_s4, 32, %s279_s19, [#allocation6]  }
  0x29   : > { %p1920_p8 = pnand %p1919_p4, %p1913_p6 }
  0x2b   : > { %1923 = shalt.err (!%p1920_p8)
}
  0x2c   : > { %s2060_s27 = smov 128   ;;  %s2061_s28 = smov 8  }
  0x2d   : > { %s2576_s7 = sld [smem:[#allocation20_spill]]  ;;  %s2192_s18 = sadd.s32 1, %s2056_s12  }
  0x2e   : > { %s36_s19 = sadd.s32 1, %s2052_s11  ;;  %s33_s20 = ssub.s32 %s2056_s12, %s2192_s18 }
  0x2f   : > { %p43_p1 = scmp.ne.s32.totalorder %s2052_s11, %s2048_s10  ;;  %p34_p2 = scmp.eq.s32.totalorder %s33_s20, 0 }
  0x30   : > { %p44_p4 = scmp.eq.s32.totalorder %s2056_s12, 0  ;;  %p2577_p6 = scmp.eq.s32.totalorder %s2141_s13, 1 }
  0x31   : > { %p1798_p9 = scmp.lt.s32.totalorder %s2056_s12, 2  ;;  %s2211_s24 = sand.u32 1, %s2052_s11  }
  0x32   : > { %p2202_p8 = por %p2577_p6, %p43_p1  ;;  %p45_p12 = por %p44_p4, %p43_p1 }
  0x33   : > { %1784 = dma.hbm_to_vmem [thread:$0]  (!%p2169_p11), %s2576_s7, 512, %s295_s21, [#allocation9], %s2060_s27, %s2060_s27, %s2061_s28  }
  0x34   : > { %s2578_s23 = scalar_select %p2202_p8, 1, 0 }
  0x35   : > { %s2208_s22 = scalar_select %p34_p2, %s2052_s11, %s36_s19  }
  0x36   : > { %s1590_s21 = sshll.u32 %s2211_s24, 3  ;;  %s1591_s25 = sshll.u32 %s2056_s12, 7 }
  0x37   : > { %2579 = sst [smem:[#allocation17_spill]] %s2208_s22  ;;  %s315_s29 = scalar_lea.vmem [#allocation2], %s1590_s21 }
  0x38   : > { %s2580_s0 = sld [smem:[#allocation18_spill]]  ;;  %s322_s14 = sshll.u32 %s315_s29, 4  ;;  %s2220_s14 = int_to_ptr.vmem [resolvable:$true] %s322_s14 }
  0x39   : > { %p2222_p11 = pnand %p1798_p9, %p45_p12  ;;  %s312_s7 = scalar_lea.sflag [#allocation3], %s2211_s24 }
  0x3b   : > { %p1926_p5 = pneg %p2222_p11 }
  0x3e   : > { %s2218_s28 = scalar_lea.hbm %s2580_s0, %s1591_s25  ;;  %s1929_s26 = scalar_lea.hbm %s2580_s0, 256 }
  0x3f   : > { %s1924_s22 = scalar_lea.hbm %s2218_s28, 128  ;;  %p1930_p13 = scmp.lt.s32.totalorder %s2218_s28, %s2580_s0 }
  0x40   : > { %p1925_p3 = scmp.ne.s32.totalorder %s2218_s28, %s1924_s22  ;;  %p1931_p0 = scmp.lt.s32.totalorder %s1929_s26, %s1924_s22 }
  0x42   : > { %p1927_p7 = pnand %p1926_p5, %p1925_p3  ;;  %p1932_p1 = por %p1931_p0, %p1930_p13 }
  0x44   : > { %p1928_p10 = pneg %p1927_p7 }
  0x46   : > { %p1933_p2 = pnand %p1932_p1, %p1928_p10 }
  0x48   : > { %1936 = shalt.err (!%p1933_p2)
}
  0x49   : > { %s1937_s20 = scalar_lea.vmem %s2220_s14, 128  ;;  %s2062_s21 = smov [#allocation2]  }
  0x4a   : > { %p1938_p4 = scmp.ne.s32.totalorder %s2220_s14, %s1937_s20  ;;  %s1942_s25 = sshll.u32 %s2062_s21, 4  ;;  %s1943_s25 = int_to_ptr.vmem [resolvable:$false] %s1942_s25 }
  0x4b   : > { %s1944_s4 = scalar_lea.vmem %s1943_s25, 256  ;;  %p1945_p12 = scmp.lt.s32.totalorder %s2220_s14, %s1943_s25 }
  0x4c   : > { %p1940_p6 = pnand %p1938_p4, %p1926_p5  ;;  %p1946_p3 = scmp.lt.s32.totalorder %s1944_s4, %s1937_s20 }
  0x4e   : > { %p1941_p9 = pneg %p1940_p6  ;;  %p1947_p7 = por %p1946_p3, %p1945_p12 }
  0x50   : > { %p1948_p13 = pnand %p1947_p7, %p1941_p9 }
  0x52   : > { %1951 = shalt.err (!%p1948_p13)
}
  0x53   : > { %1788 = dma.hbm_to_vmem [thread:$0]  (!%p2222_p11), %s2218_s28, 128, %s2220_s14, %s312_s7  }
  0x54   : > { %s1593_s22 = sshll.u32 %s2056_s12, 5  ;;  %s2582_s21 = sshll.u32 %s2211_s24, 1 }
  0x55   : > { %s2257_s29 = scalar_lea.hbm %s2553_s1, %s1593_s22  ;;  %s333_s4 = scalar_lea.vmem [#allocation5], %s2582_s21 }
  0x56   : > { %s340_s20 = sshll.u32 %s333_s4, 4  ;;  %s2583_s25 = sand.u32 1, %s2056_s12   ;;  %s341_s20 = int_to_ptr.vmem [resolvable:$true] %s340_s20 }
  0x57   : > { %s330_s0 = scalar_lea.sflag [#allocation6], %s2583_s25  ;;  %s1952_s11 = scalar_lea.hbm %s2257_s29, 32 }
  0x58   : > { %p1953_p10 = scmp.ne.s32.totalorder %s2257_s29, %s1952_s11  ;;  %s1957_s14 = scalar_lea.hbm %s2553_s1, 64 }
  0x59   : > { %p1958_p2 = scmp.lt.s32.totalorder %s2257_s29, %s2553_s1  ;;  %p1959_p4 = scmp.lt.s32.totalorder %s1957_s14, %s1952_s11 }
  0x5a   : > { %p1955_p0 = pnand %p1953_p10, %p1926_p5 }
  0x5b   : > { %p1960_p6 = por %p1959_p4, %p1958_p2 }
  0x5c   : > { %p1956_p1 = pneg %p1955_p0 }
  0x5e   : > { %p1961_p9 = pnand %p1960_p6, %p1956_p1 }
  0x60   : > { %1964 = shalt.err (!%p1961_p9)
}
  0x61   : > { %s1965_s26 = scalar_lea.vmem %s341_s20, 32  ;;  %s2063_s27 = smov [#allocation5]  }
  0x62   : > { %p1966_p12 = scmp.ne.s32.totalorder %s341_s20, %s1965_s26  ;;  %s1970_s21 = sshll.u32 %s2063_s27, 4  ;;  %s1971_s21 = int_to_ptr.vmem [resolvable:$false] %s1970_s21 }
  0x63   : > { %s1972_s4 = scalar_lea.vmem %s1971_s21, 64  ;;  %p1973_p13 = scmp.lt.s32.totalorder %s341_s20, %s1971_s21 }
  0x64   : > { %p1968_p3 = pnand %p1966_p12, %p1926_p5  ;;  %p1974_p10 = scmp.lt.s32.totalorder %s1972_s4, %s1965_s26 }
  0x66   : > { %p1969_p7 = pneg %p1968_p3  ;;  %p1975_p0 = por %p1974_p10, %p1973_p13 }
  0x68   : > { %p1976_p8 = pnand %p1975_p0, %p1969_p7 }
  0x6a   : > { %1979 = shalt.err (!%p1976_p8)
}
  0x6b   : > { %1791 = dma.hbm_to_vmem [thread:$0]  (!%p2222_p11), %s2257_s29, 32, %s341_s20, %s330_s0  }
  0x6c   : > { %p2584_p1 = scmp.ne.s32.totalorder %s2573_s17, 0 }
  0x6d   : > { %s2284_s11 = sand.u32 (!%p2584_p1), 1, %s2048_s10   ;;  %p2585_p8 = scmp.ne.s32.totalorder (!%p2584_p1), %s2571_s15, 0 }
  0x6e   : > { %349 = sbr.rel (%p2584_p1) target bundleno = 3375 (0xd2f), region = 56  ;;  %s1595_s25 = sshll.u32 (!%p2584_p1), %s2284_s11, 3 }
  0x6f   : > { %s352_s7 = scalar_lea.sflag (!%p2584_p1), [#allocation3], %s2284_s11  ;;  %s2290_s28 = scalar_lea.vmem (!%p2584_p1), [#allocation2], %s1595_s25 }
  0x73   : > { %2023 = dma.done.wait (%p2585_p8), %s352_s7, 128  }
  0x74   : > { %2025 = vsyncadd (%p2585_p8), %s352_s7, 4294967168  ;;  %s360_s0 = sand.u32 1, %s2141_s13   ;;  %s1596_s17 = sshll.u32 %s2284_s11, 1 }
  0x75   : > { %s361_s19 = scalar_lea.sflag [#allocation6], %s360_s0  ;;  %s2298_s29 = scalar_lea.vmem [#allocation5], %s1596_s17 }
  0x76   : > { %2027 = dma.done.wait (%p2585_p8), %s361_s19, 32  }
  0x77   : > { %2029 = vsyncadd (%p2585_p8), %s361_s19, 4294967264  ;;  %p2586_p11 = scmp.eq.s32.totalorder %s2141_s13, 0 }
  0x79   : > { %2031 = dma.done.wait (%p2586_p11), [#allocation6], 32   ;;  %p2587_p5 = pmov %p2586_p11 }
  0x7b   : > { %2033 = vsyncadd (%p2587_p5), [#allocation6], 4294967264  ;;  %p2588_p2 = pmov %p2587_p5 }
  0x7d   : > { %2035 = dma.done.wait (%p2588_p2), [#allocation9], 512   ;;  %p2589_p4 = pmov %p2588_p2 }
  0x7e   : > { %v2064_v0 = vmov 0.0   ;;  %vm2065_vm0 = vmmov 0   ;;  %v416_v1 = vld [vmem:[%s2554_s2 + $0x18] sm:$0xff]  ;;  %v415_v2 = vld [vmem:[%s2554_s2 + $0x10] sm:$0xff]  ;;  %v414_v4 = vld [vmem:[%s2554_s2 + $0x8] sm:$0xff]  ;;  %vm436_vm1 = vcmask 261120   ;;  %v666_v23 = vlaneseq }
  0x7f   : > { %2037 = vsyncadd (%p2589_p4), [#allocation9], 4294966784  ;;  %1665 = vmatprep.subr.mxu0 %v2064_v0  ;;  %1673 = vmatprep.mubr.msk.f32.mxu0 %vm2065_vm0, %v2064_v0  ;;  %v424_v3 = vld [vmem:[%s2555_s3 + $0x38] sm:$0xff]  ;;  %v423_v5 = vld [vmem:[%s2555_s3 + $0x30] sm:$0xff]  ;;  %v2066_v14 = vmov 0   ;;  %vm510_vm2 = vcmask 523264  }
  0x80   : > { %1676 = vmatprep.subr.mxu1 %v2064_v0  ;;  %1692 = vmatprep.mubr.msk.f32.mxu1 %vm2065_vm0, %v2064_v0  ;;  %v422_v6 = vld [vmem:[%s2555_s3 + $0x28] sm:$0xff]  ;;  %v413_v7 = vld [vmem:[%s2554_s2] sm:$0xff]  ;;  %v420_v10 = vld [vmem:[%s2555_s3 + $0x18] sm:$0xff]  ;;  %v2067_v21 = vmov 1   ;;  %v2379_v24 = vshrl.u32 %v666_v23, 7  ;;  %vm675_vm5 = vcmask 64512  }
  0x81   : > { %1666 = vmatpush3.msra.mxu0 %v416_v1  ;;  %1677 = vmatpush3.msra.mxu1 %v424_v3  ;;  %v2343_v8 = vld [vmem:[%s2290_s28] sm:$0xff]  ;;  %v419_v11 = vld [vmem:[%s2555_s3 + $0x10] sm:$0xff]  ;;  %s1618_s7 = sshll.u32 %s2141_s13, 7  ;;  %s1460_s20 = scalar_lea.sflag [#allocation4], %s2284_s11 }
  0x82   : > { %1667 = vmatprep.subr.mxu0 %v2064_v0  ;;  %1678 = vmatprep.subr.mxu1 %v2064_v0  ;;  %v421_v9 = vld [vmem:[%s2555_s3 + $0x20] sm:$0xff]  ;;  %v418_v12 = vld [vmem:[%s2555_s3 + $0x8] sm:$0xff]  ;;  %v425_v16 = vld [vmem:[#allocation7] sm:$0x3]  ;;  %v2383_v26 = vsub.s32 0, %v2379_v24  ;;  %v2389_v30 = vsub.s32 1, %v2379_v24  ;;  %s1471_s15 = scalar_lea.hbm %s2561_s9, %s1618_s7 }
  0x83   : > { %1668 = vmatpush3.msra.mxu0 %v415_v2  ;;  %1679 = vmatpush3.msra.mxu1 %v423_v5  ;;  %v417_v13 = vld [vmem:[%s2555_s3] sm:$0xff]  ;;  %v584_v25 = vld [vmem:[%s2298_s29] sm:$0x3]  ;;  %s2068_s29 = smov 96   ;;  %p2590_p9 = scmp.ne.s32.totalorder %s2578_s23, 0 }
  0x84   : > { %1669 = vmatprep.subr.mxu0 %v2064_v0  ;;  %1680 = vmatprep.subr.mxu1 %v2064_v0  ;;  %v585_v27 = vunpack.c.0.s8 %v584_v25  ;;  %s2069_s22 = smov [#allocation10]  }
  0x85   : > { %1670 = vmatpush3.msra.mxu0 %v414_v4  ;;  %1681 = vmatpush3.msra.mxu1 %v422_v6  ;;  %s1984_s13 = sshll.u32 %s2069_s22, 4  ;;  %s1985_s13 = int_to_ptr.vmem [resolvable:$false] %s1984_s13 }
  0x86   : > { %1671 = vmatprep.subr.mxu0 %v2064_v0  ;;  %1682 = vmatprep.subr.mxu1 %v2064_v0  ;;  %v2386_v29 = vcvt.s32.f32 %v585_v27 }
  0x87   : > { %1672 = vmatpush3.msra.mxu0 %v413_v7  ;;  %1683 = vmatpush3.msra.mxu1 %v421_v9 }
  0x88   : > { %1674 = vmatmul.mubr.msk.f32.vlgmr.msra.gmra.mxu0 %vm436_vm1, %v2343_v8  ;;  %1684 = vmatprep.subr.mxu1 %v2064_v0  ;;  %vm587_vm3 = vcmp.gt.f32.partialorder %v2386_v29, 0.0 }
  0x89   : > { %1695 = vmatprep.subr.mxu0 %v2064_v0  ;;  %1685 = vmatpush3.msra.mxu1 %v420_v10 }
  0x8a   : > { %1697 = vmatprep.mubr.msk.f32.mxu0 %vm2065_vm0, %v2064_v0  ;;  %1686 = vmatprep.subr.mxu1 %v2064_v0 }
  0x8b   : > { %1687 = vmatpush3.msra.mxu1 %v419_v11  ;;  %1843 = vset.pattern.permute.xlu0 %v2066_v14 }
  0x8c   : > { %1688 = vmatprep.subr.mxu1 %v2064_v0 }
  0x8d   : > { %1689 = vmatpush3.msra.mxu1 %v418_v12 }
  0x8e   : > { %1690 = vmatprep.subr.mxu1 %v2064_v0 }
  0x8f   : > { %1691 = vmatpush3.msra.mxu1 %v417_v13 }
  0x90   : > { %1710 = vmatprep.subr.mxu1 %v2064_v0 }
 0x148   : > { %v506_v15 = vpop.f32.mrf.mxu0 }
 0x149   : > { %1693 = vmatmul.mubr.msk.f32.vlgmr.msra.gmra.mxu1 %vm510_vm2, %v506_v15  ;;  %1696 = vmatpush3.xpose.msk.msra.mxu0 %vm510_vm2, %v506_v15 }
 0x14a   : > { %v1675_v17 = vpop.f32.mrf.mxu0  ;;  %1700 = vmatprep.subr.mxu0 %v2064_v0  ;;  %1718 = vmatprep.mubr.msk.f32.mxu1 %vm2065_vm0, %v2064_v0 }
 0x14b   : > { %v1609_v17 = vld [vmem:[%s2557_s5 + $0x38] sm:$0xff] }
 0x14c   : > { %1698 = vmatmul.mubr.msk.f32.vlgmr.msra.gmra.mxu0 %vm510_vm2, %v425_v16  ;;  %v795_v16 = vld [vmem:[%s2557_s5 + $0x10] sm:$0xff]  ;;  %1711 = vmatpush3.msra.mxu1 %v1609_v17 }
 0x14d   : > { %1701 = vmatpush3.msra.mxu0 %v506_v15  ;;  %1702 = vmatprep.mubr.msk.f32.mxu0 %vm2065_vm0, %v2064_v0 }
 0x14e   : > { %1705 = vmatprep.subr.mxu0 %v2064_v0  ;;  %1712 = vmatprep.subr.mxu1 %v2064_v0 }
 0x209   : > { %v580_v18 = vpop.f32.mrf.mxu1 }
 0x20a   : > { %663 = vperm.xlu0 %1843, %v580_v18  }
 0x20b   : > { %v1694_v19 = vpop.f32.mrf.mxu1 }
 0x20c   : > { %v657_v20 = vpop.f32.mrf.mxu0  ;;  %v794_v19 = vld [vmem:[%s2557_s5 + $0x8] sm:$0xff] }
 0x20d   : > { %v669_v28 = vrot.slane %v657_v20, %v2383_v26  ;;  %v804_v34 = vrot.slane %v657_v20, %v2389_v30  ;;  %v793_v20 = vld [vmem:[%s2557_s5] sm:$0xff] }
 0x20e   : > { %1844 = vset.pattern.permute.xlu0 %v2067_v21  ;;  %v1699_v22 = vpop.f32.mrf.mxu0  ;;  %v1607_v21 = vld [vmem:[%s2557_s5 + $0x28] sm:$0xff] }
 0x20f   : > { %798 = vperm.xlu0 %1844, %v580_v18   ;;  %v1608_v18 = vld [vmem:[%s2557_s5 + $0x30] sm:$0xff]  ;;  %v1606_v22 = vld [vmem:[%s2557_s5 + $0x20] sm:$0xff] }
 0x210   : > { %1713 = vmatpush3.msra.mxu1 %v1608_v18 }
 0x211   : > { %1714 = vmatprep.subr.mxu1 %v2064_v0 }
 0x212   : > { %1715 = vmatpush3.msra.mxu1 %v1607_v21 }
 0x213   : > { %1845 = vset.pattern.permute.xlu0 %v2066_v14  ;;  %1716 = vmatprep.subr.mxu1 %v2064_v0 }
 0x214   : > { %1717 = vmatpush3.msra.mxu1 %v1606_v22 }
 0x215   : > { %1732 = vmatprep.subr.mxu1 %v2064_v0 }
 0x285   : > { %v664_v31 = vpop.permute.xlu0 %663 }
 0x286   : > { %v670_v32 = vadd.f32 %v669_v28, %v664_v31 }
 0x288   : > { %v672_v33 = vmul.f32 0.02, %v670_v32  ;;  %vm671_vm4 = vcmp.gt.f32.partialorder %v670_v32, 0.0 }
 0x28a   : > { %v799_v35 = vpop.permute.xlu0 %798  ;;  %v673_v36 = vsel %vm671_vm4, %v670_v32, %v672_v33  ;;  %v2447_v33 = vld [vmem:[%s2560_s8] sm:$0xff] }
 0x28b   : > { %v805_v37 = vadd.f32 %v804_v34, %v799_v35  ;;  %v674_v38 = vsel %vm587_vm3, %v673_v36, -9e+15  ;;  %v781_v34 = vsub.s32 2, %v2379_v24  ;;  %v777_v35 = vrot.slane %v2447_v33, %v2383_v26 }
 0x28c   : > { %v676_v39 = vsel %vm675_vm5, %v674_v38, -inf }
 0x28d   : > { %v807_v40 = vmul.f32 0.02, %v805_v37  ;;  %677 = vmax.xlane.f32.xlu1 %v676_v39  ;;  %vm806_vm6 = vcmp.gt.f32.partialorder %v805_v37, 0.0  ;;  %v917_v39 = vsub.s32 3, %v2379_v24 }
 0x28f   : > { %v808_v41 = vsel %vm806_vm6, %v805_v37, %v807_v40  ;;  %v782_v37 = vrot.slane %v2447_v33, %v781_v34 }
 0x290   : > { %v809_v42 = vsel %vm587_vm3, %v808_v41, -9e+15  ;;  %v913_v41 = vrot.slane %v2447_v33, %v2389_v30 }
 0x291   : > { %v810_v43 = vsel %vm675_vm5, %v809_v42, -inf }
 0x292   : > { %811 = vmax.xlane.f32.xlu1 %v810_v43 }
 0x316   : > { %v678_v44 = vpop.xlane.xlu1 %677 }
 0x317   : > { %v679_v45 = vsub.f32 %v674_v38, %v678_v44  ;;  %v918_v44 = vrot.slane %v2447_v33, %v917_v39 }
 0x319   : > { %v680_v46 = vmul.f32 1.442695, %v679_v45 }
 0x31b   : > { %1846 = vpow2.f32 %v680_v46  ;;  %v812_v47 = vpop.xlane.xlu1 %811 }
 0x31c   : > { %v813_v48 = vsub.f32 %v809_v42, %v812_v47 }
 0x31e   : > { %v814_v49 = vmul.f32 1.442695, %v813_v48 }
 0x320   : > { %1848 = vpow2.f32 %v814_v49 }
 0x328   : > { %v1847_v50 = vpop.eup %1846 }
 0x329   : > { %v682_v51 = vsel %vm675_vm5, %v1847_v50, 0.0 }
 0x32a   : > { %683 = vadd.xlane.f32.xlu1 %v682_v51 }
 0x32d   : > { %v1849_v52 = vpop.eup %1848 }
 0x32e   : > { %v816_v53 = vsel %vm675_vm5, %v1849_v52, 0.0 }
 0x32f   : > { %817 = vadd.xlane.f32.xlu0 %v816_v53 }
 0x33b   : > { %821 = vrot.lane.b32.xlu1 %v506_v15, %s2068_s29  ;;  %v796_v15 = vld [vmem:[%s2557_s5 + $0x18] sm:$0xff]  ;;  %s411_s29 = scalar_lea.vmem [#allocation10], %s1595_s25  ;;  %s1986_s25 = scalar_lea.vmem %s1985_s13, 256 }
 0x33c   : > { %s1473_s0 = sshll.u32 %s411_s29, 4  ;;  %s1474_s0 = int_to_ptr.vmem [resolvable:$true] %s1473_s0 }
 0x33d   : > { %s1980_s14 = scalar_lea.vmem %s1474_s0, 128  ;;  %p1987_p7 = scmp.lt.s32.totalorder %s1474_s0, %s1985_s13 }
 0x33e   : > { %p1981_p6 = scmp.ne.s32.totalorder %s1474_s0, %s1980_s14  ;;  %p1988_p13 = scmp.lt.s32.totalorder %s1986_s25, %s1980_s14 }
 0x340   : > { %p1982_p12 = pnand %p1981_p6, %p2590_p9  ;;  %p1989_p10 = por %p1988_p13, %p1987_p7 }
 0x342   : > { %p1983_p3 = pneg %p1982_p12 }
 0x344   : > { %p1990_p0 = pnand %p1989_p10, %p1983_p3 }
 0x3b3   : > { %v684_v54 = vpop.xlane.xlu1 %683 }
 0x3b4   : > { %1850 = vrcp.f32 %v684_v54 }
 0x3b7   : > { %v822_v58 = vpop.permute.xlu1 %821 }
 0x3b8   : > { %v818_v55 = vpop.xlane.xlu0 %817 }
 0x3b9   : > { %1852 = vrcp.f32 %v818_v55 }
 0x3c1   : > { %v1851_v56 = vpop.eup %1850 }
 0x3c2   : > { %v686_v57 = vmul.f32 %v1851_v56, %v1847_v50 }
 0x3c4   : > { %1703 = vmatmul.mubr.msk.f32.vlgmr.msra.gmra.mxu0 %vm675_vm5, %v686_v57 }
 0x3c5   : > { %1706 = vmatpush3.msra.mxu0 %v822_v58  ;;  %1707 = vmatprep.mubr.msk.f32.mxu0 %vm2065_vm0, %v2064_v0 }
 0x3c6   : > { %v1853_v59 = vpop.eup %1852  ;;  %1721 = vmatprep.subr.mxu0 %v2064_v0 }
 0x3c7   : > { %v820_v60 = vmul.f32 %v1853_v59, %v1849_v52 }
 0x3c9   : > { %1708 = vmatmul.mubr.msk.f32.vlgmr.msra.gmra.mxu0 %vm675_vm5, %v820_v60 }
 0x3ca   : > { %1729 = vmatprep.mubr.msk.f32.mxu0 %vm2065_vm0, %v2064_v0  ;;  %1722 = vmatpush3.msra.mxu0 %v796_v15 }
 0x3cb   : > { %1723 = vmatprep.subr.mxu0 %v2064_v0 }
 0x3cc   : > { %1724 = vmatpush3.msra.mxu0 %v795_v16 }
 0x3cd   : > { %1725 = vmatprep.subr.mxu0 %v2064_v0 }
 0x3ce   : > { %1726 = vmatpush3.msra.mxu0 %v794_v19 }
 0x3cf   : > { %1727 = vmatprep.subr.mxu0 %v2064_v0 }
 0x3d0   : > { %1728 = vmatpush3.msra.mxu0 %v793_v20 }
 0x3d1   : > { %1743 = vmatprep.subr.mxu0 %v2064_v0 }
 0x484   : > { %v756_v61 = vpop.f32.mrf.mxu0 }
 0x485   : > { %v760_v62 = vsel %vm436_vm1, %v756_v61, 0.0 }
 0x486   : > { %761 = vadd.xlane.f32.xlu1 %v760_v62  ;;  %v1704_v63 = vpop.f32.mrf.mxu0 }
 0x489   : > { %v893_v1 = vpop.f32.mrf.mxu0 }
 0x48a   : > { %v897_v2 = vsel %vm436_vm1, %v893_v1, 0.0 }
 0x48b   : > { %898 = vadd.xlane.f32.xlu0 %v897_v2  ;;  %v1709_v3 = vpop.f32.mrf.mxu0 }
 0x48c   : > { %v429_v3 = vld [vmem:[%s2558_s6 + $0x18] sm:$0xff] }
 0x50f   : > { %v762_v4 = vpop.xlane.xlu1 %761 }
 0x510   : > { %v764_v5 = vmul.f32 0.03125, %v762_v4  ;;  %v428_v4 = vld [vmem:[%s2558_s6 + $0x10] sm:$0xff] }
 0x512   : > { %v765_v6 = vsub.f32 %v756_v61, %v764_v5  ;;  %v427_v5 = vld [vmem:[%s2558_s6 + $0x8] sm:$0xff] }
 0x514   : > { %v899_v7 = vpop.xlane.xlu0 %898  ;;  %v766_v9 = vmul.f32 %v765_v6, %v765_v6 }
 0x515   : > { %v900_v10 = vmul.f32 0.03125, %v899_v7 }
 0x516   : > { %v767_v11 = vsel %vm436_vm1, %v766_v9, 0.0 }
 0x517   : > { %v901_v12 = vsub.f32 %v893_v1, %v900_v10  ;;  %768 = vadd.xlane.f32.xlu0 %v767_v11 }
 0x519   : > { %v902_v13 = vmul.f32 %v901_v12, %v901_v12 }
 0x51b   : > { %v903_v14 = vsel %vm436_vm1, %v902_v13, 0.0  ;;  %v1154_v13 = vrot.slane %v2447_v33, 4 }
 0x51c   : > { %904 = vadd.xlane.f32.xlu0 %v903_v14 }
 0x5a0   : > { %v769_v23 = vpop.xlane.xlu0 %768 }
 0x5a1   : > { %v770_v25 = vmul.f32 0.03125, %v769_v23 }
 0x5a3   : > { %v771_v27 = vadd.f32 1e-05, %v770_v25 }
 0x5a5   : > { %1854 = vrsqrt.f32 %v771_v27  ;;  %v905_v28 = vpop.xlane.xlu0 %904 }
 0x5a6   : > { %v906_v31 = vmul.f32 0.03125, %v905_v28 }
 0x5a8   : > { %v907_v32 = vadd.f32 1e-05, %v906_v31 }
 0x5aa   : > { %1856 = vrsqrt.f32 %v907_v32 }
 0x5b2   : > { %v1855_v36 = vpop.eup %1854 }
 0x5b3   : > { %v773_v38 = vmul.f32 %v1855_v36, %v765_v6  ;;  %v426_v6 = vld [vmem:[%s2558_s6] sm:$0xff] }
 0x5b5   : > { %v778_v40 = vmul.f32 %v777_v35, %v773_v38 }
 0x5b7   : > { %v1857_v42 = vpop.eup %1856  ;;  %v783_v43 = vadd.f32 %v782_v37, %v778_v40 }
 0x5b8   : > { %v909_v45 = vmul.f32 %v1857_v42, %v901_v12 }
 0x5b9   : > { %v785_v46 = vmul.f32 0.044715, %v783_v43  ;;  %v784_v59 = vmul.f32 0.5, %v783_v43 }
 0x5ba   : > { %v914_v47 = vmul.f32 %v913_v41, %v909_v45  ;;  %v433_v45 = vld [vmem:[#allocation8 + $0x18] sm:$0xff] }
 0x5bb   : > { %v786_v48 = vmul.f32 %v785_v46, %v783_v43  ;;  %v432_v46 = vld [vmem:[#allocation8 + $0x10] sm:$0xff] }
 0x5bc   : > { %v919_v49 = vadd.f32 %v918_v44, %v914_v47  ;;  %v431_v47 = vld [vmem:[#allocation8 + $0x8] sm:$0xff] }
 0x5bd   : > { %v787_v50 = vmul.f32 %v786_v48, %v783_v43  ;;  %v430_v48 = vld [vmem:[#allocation8] sm:$0xff] }
 0x5be   : > { %v921_v51 = vmul.f32 0.044715, %v919_v49  ;;  %v920_v63 = vmul.f32 0.5, %v919_v49 }
 0x5bf   : > { %v788_v52 = vadd.f32 %v787_v50, %v783_v43 }
 0x5c0   : > { %v922_v53 = vmul.f32 %v921_v51, %v919_v49 }
 0x5c1   : > { %v789_v54 = vmul.f32 0.7978846, %v788_v52  ;;  %v1340_v52 = vsub.s32 5, %v2379_v24 }
 0x5c2   : > { %v923_v55 = vmul.f32 %v922_v53, %v919_v49  ;;  %v1345_v53 = vsub.s32 6, %v2379_v24 }
 0x5c3   : > { %1858 = vtanh.f32 %v789_v54  ;;  %v1341_v54 = vrot.slane %v2447_v33, %v1340_v52 }
 0x5c4   : > { %v924_v56 = vadd.f32 %v923_v55, %v919_v49 }
 0x5c6   : > { %v925_v57 = vmul.f32 0.7978846, %v924_v56  ;;  %v1346_v56 = vrot.slane %v2447_v33, %v1345_v53 }
 0x5c8   : > { %1860 = vtanh.f32 %v925_v57 }
 0x5d0   : > { %v1859_v58 = vpop.eup %1858 }
 0x5d1   : > { %v791_v60 = vadd.f32 1.0, %v1859_v58 }
 0x5d3   : > { %v792_v61 = vmul.f32 %v791_v60, %v784_v59 }
 0x5d5   : > { %v1861_v62 = vpop.eup %1860  ;;  %1730 = vmatmul.mubr.msk.f32.vlgmr.msra.gmra.mxu0 %vm436_vm1, %v792_v61 }
 0x5d6   : > { %v927_v1 = vadd.f32 1.0, %v1861_v62  ;;  %1745 = vmatprep.mubr.msk.f32.mxu0 %vm2065_vm0, %v2064_v0 }
 0x5d8   : > { %v928_v2 = vmul.f32 %v927_v1, %v920_v63 }
 0x5da   : > { %1719 = vmatmul.mubr.msk.f32.vlgmr.msra.gmra.mxu1 %vm436_vm1, %v928_v2 }
 0x5db   : > { %1740 = vmatprep.mubr.msk.f32.mxu1 %vm2065_vm0, %v2064_v0  ;;  %1733 = vmatpush3.msra.mxu1 %v429_v3 }
 0x5dc   : > { %1734 = vmatprep.subr.mxu1 %v2064_v0 }
 0x5dd   : > { %1735 = vmatpush3.msra.mxu1 %v428_v4 }
 0x5de   : > { %1736 = vmatprep.subr.mxu1 %v2064_v0 }
 0x5df   : > { %1737 = vmatpush3.msra.mxu1 %v427_v5  ;;  %v1359_v5 = vsub.s32 7, %v2379_v24 }
 0x5e0   : > { %1738 = vmatprep.subr.mxu1 %v2064_v0 }
 0x5e1   : > { %1739 = vmatpush3.msra.mxu1 %v426_v6  ;;  %v1360_v6 = vrot.slane %v2447_v33, %v1359_v5 }
 0x5e2   : > { %1753 = vmatprep.subr.mxu1 %v2064_v0 }
 0x695   : > { %v1076_v7 = vpop.f32.mrf.mxu0 }
 0x697   : > { %v1731_v9 = vpop.f32.mrf.mxu0 }
 0x69a   : > { %v1003_v10 = vpop.f32.mrf.mxu1 }
 0x69b   : > { %v1077_v11 = vadd.f32 %v1076_v7, %v1003_v10 }
 0x69c   : > { %v1720_v12 = vpop.f32.mrf.mxu1 }
 0x69d   : > { %1741 = vmatmul.mubr.msk.f32.vlgmr.msra.gmra.mxu1 %vm436_vm1, %v1077_v11  ;;  %1744 = vmatpush3.xpose.msk.msra.mxu0 %vm436_vm1, %v1077_v11 }
 0x69e   : > { %1748 = vmatprep.subr.mxu0 %v2064_v0  ;;  %1761 = vmatprep.mubr.msk.f32.mxu1 %vm2065_vm0, %v2064_v0 }
 0x69f   : > { %1754 = vmatpush3.msra.mxu1 %v433_v45 }
 0x6a0   : > { %1746 = vmatmul.mubr.msk.f32.vlgmr.msra.gmra.mxu0 %vm436_vm1, %v1154_v13  ;;  %1755 = vmatprep.subr.mxu1 %v2064_v0 }
 0x6a1   : > { %1749 = vmatpush3.msra.mxu0 %v1077_v11  ;;  %1750 = vmatprep.mubr.msk.f32.mxu0 %vm2065_vm0, %v2064_v0 }
 0x6a2   : > { %1756 = vmatpush3.msra.mxu1 %v432_v46 }
 0x6a3   : > { %1757 = vmatprep.subr.mxu1 %v2064_v0 }
 0x6a4   : > { %1758 = vmatpush3.msra.mxu1 %v431_v47 }
 0x6a5   : > { %1759 = vmatprep.subr.mxu1 %v2064_v0 }
 0x6a6   : > { %1760 = vmatpush3.msra.mxu1 %v430_v48 }
 0x75d   : > { %v1149_v14 = vpop.f32.mrf.mxu1 }
 0x75e   : > { %1229 = vperm.xlu0 %1845, %v1149_v14  }
 0x75f   : > { %v1742_v15 = vpop.f32.mrf.mxu1 }
 0x760   : > { %v1223_v16 = vpop.f32.mrf.mxu0 }
 0x761   : > { %v1235_v18 = vrot.slane %v1223_v16, %v2383_v26 }
 0x762   : > { %v1747_v17 = vpop.f32.mrf.mxu0 }
 0x7d9   : > { %v1230_v19 = vpop.permute.xlu0 %1229 }
 0x7da   : > { %v1236_v20 = vadd.f32 %v1235_v18, %v1230_v19 }
 0x7dc   : > { %v1238_v21 = vmul.f32 0.02, %v1236_v20  ;;  %vm1237_vm7 = vcmp.gt.f32.partialorder %v1236_v20, 0.0 }
 0x7de   : > { %v1239_v22 = vsel %vm1237_vm7, %v1236_v20, %v1238_v21 }
 0x7df   : > { %v1240_v23 = vsel %vm587_vm3, %v1239_v22, -9e+15 }
 0x7e0   : > { %v1241_v25 = vsel %vm675_vm5, %v1240_v23, -inf }
 0x7e1   : > { %1242 = vmax.xlane.f32.xlu1 %v1241_v25 }
 0x86a   : > { %v1243_v27 = vpop.xlane.xlu1 %1242 }
 0x86b   : > { %v1244_v28 = vsub.f32 %v1240_v23, %v1243_v27 }
 0x86d   : > { %v1245_v31 = vmul.f32 1.442695, %v1244_v28 }
 0x86f   : > { %1862 = vpow2.f32 %v1245_v31 }
 0x87c   : > { %v1863_v32 = vpop.eup %1862 }
 0x87d   : > { %v1247_v34 = vsel %vm675_vm5, %v1863_v32, 0.0 }
 0x87e   : > { %1248 = vadd.xlane.f32.xlu1 %v1247_v34 }
 0x907   : > { %v1249_v35 = vpop.xlane.xlu1 %1248 }
 0x908   : > { %1864 = vrcp.f32 %v1249_v35 }
 0x915   : > { %v1865_v36 = vpop.eup %1864 }
 0x916   : > { %v1251_v37 = vmul.f32 %v1865_v36, %v1863_v32 }
 0x918   : > { %1751 = vmatmul.mubr.msk.f32.vlgmr.msra.gmra.mxu0 %vm675_vm5, %v1251_v37 }
 0x9d8   : > { %v1321_v38 = vpop.f32.mrf.mxu0 }
 0x9d9   : > { %v1325_v29 = vsel %vm436_vm1, %v1321_v38, 0.0 }
 0x9da   : > { %1326 = vadd.xlane.f32.xlu1 %v1325_v29  ;;  %v1752_v39 = vpop.f32.mrf.mxu0 }
 0xa63   : > { %v1327_v40 = vpop.xlane.xlu1 %1326 }
 0xa64   : > { %v1328_v41 = vmul.f32 0.03125, %v1327_v40 }
 0xa66   : > { %v1329_v42 = vsub.f32 %v1321_v38, %v1328_v41 }
 0xa68   : > { %v1330_v43 = vmul.f32 %v1329_v42, %v1329_v42 }
 0xa6a   : > { %v1331_v44 = vsel %vm436_vm1, %v1330_v43, 0.0 }
 0xa6b   : > { %1332 = vadd.xlane.f32.xlu1 %v1331_v44 }
 0xaf4   : > { %v1333_v49 = vpop.xlane.xlu1 %1332 }
 0xaf5   : > { %v1334_v50 = vmul.f32 0.03125, %v1333_v49 }
 0xaf7   : > { %v1335_v51 = vadd.f32 1e-05, %v1334_v50 }
 0xaf9   : > { %1866 = vrsqrt.f32 %v1335_v51 }
 0xb06   : > { %v1867_v55 = vpop.eup %1866 }
 0xb07   : > { %v1337_v57 = vmul.f32 %v1867_v55, %v1329_v42 }
 0xb09   : > { %v1342_v58 = vmul.f32 %v1341_v54, %v1337_v57 }
 0xb0b   : > { %v1347_v59 = vadd.f32 %v1346_v56, %v1342_v58 }
 0xb0d   : > { %v1349_v60 = vmul.f32 0.044715, %v1347_v59  ;;  %v1348_v2 = vmul.f32 0.5, %v1347_v59 }
 0xb0f   : > { %v1350_v61 = vmul.f32 %v1349_v60, %v1347_v59 }
 0xb11   : > { %v1351_v0 = vmul.f32 %v1350_v61, %v1347_v59 }
 0xb13   : > { %v1352_v62 = vadd.f32 %v1351_v0, %v1347_v59 }
 0xb15   : > { %v1353_v63 = vmul.f32 0.7978846, %v1352_v62 }
 0xb17   : > { %1868 = vtanh.f32 %v1353_v63 }
 0xb24   : > { %v1869_v1 = vpop.eup %1868 }
 0xb25   : > { %v1355_v3 = vadd.f32 1.0, %v1869_v1 }
 0xb27   : > { %v1356_v4 = vmul.f32 %v1355_v3, %v1348_v2 }
 0xb29   : > { %1762 = vmatmul.mubr.msk.f32.vlgmr.msra.gmra.mxu1 %vm436_vm1, %v1356_v4 }
 0xbe9   : > { %v1430_v7 = vpop.f32.mrf.mxu1 }
 0xbea   : > { %v1431_v9 = vadd.f32 %v1430_v7, %v1360_v6 }
 0xbeb   : > { %v1763_v10 = vpop.f32.mrf.mxu1 }
 0xbec   : > { %v1434_v11 = vadd.f32 %v1431_v9, %v2343_v8  ;;  %v435_v8 = vld [vmem:[%s2560_s8 + $0x8] sm:$0x3] }
 0xbed   : > { %v1451_v19 = vrot.slane %v435_v8, %v2383_v26  ;;  %v1456_v21 = vrot.slane %v435_v8, %v2389_v30 }
 0xbee   : > { %v1435_v12 = vsel %vm436_vm1, %v1434_v11, 0.0 }
 0xbef   : > { %1436 = vadd.xlane.f32.xlu1 %v1435_v12 }
 0xc78   : > { %v1437_v13 = vpop.xlane.xlu1 %1436 }
 0xc79   : > { %v1438_v14 = vmul.f32 0.03125, %v1437_v13 }
 0xc7b   : > { %v1439_v15 = vsub.f32 %v1434_v11, %v1438_v14 }
 0xc7d   : > { %v1440_v16 = vmul.f32 %v1439_v15, %v1439_v15 }
 0xc7f   : > { %v1441_v17 = vsel %vm436_vm1, %v1440_v16, 0.0 }
 0xc80   : > { %1442 = vadd.xlane.f32.xlu1 %v1441_v17 }
 0xd09   : > { %v1443_v24 = vpop.xlane.xlu1 %1442 }
 0xd0a   : > { %v1444_v18 = vmul.f32 0.03125, %v1443_v24 }
 0xd0c   : > { %v1445_v33 = vadd.f32 1e-05, %v1444_v18 }
 0xd0e   : > { %1870 = vrsqrt.f32 %v1445_v33 }
 0xd1b   : > { %v1871_v20 = vpop.eup %1870 }
 0xd1c   : > { %v1447_v22 = vmul.f32 %v1871_v20, %v1439_v15 }
 0xd1e   : > { %v1452_v23 = vmul.f32 %v1451_v19, %v1447_v22 }
 0xd20   : > { %v1457_v25 = vadd.f32 %v1456_v21, %v1452_v23 }
 0xd22   : > { %1458 = vst.msk [vmem:[%s411_s29] sm:$0xff] %vm436_vm1, %v1457_v25 }
 0xd23   : > { %1993 = shalt.err (!%p1990_p0)
}
 0xd24   : > { %s1994_s24 = scalar_lea.hbm %s1471_s15, 128  ;;  %s1998_s26 = scalar_lea.hbm %s2561_s9, 256 }
 0xd25   : > { %p1995_p1 = scmp.ne.s32.totalorder %s1471_s15, %s1994_s24  ;;  %p1999_p5 = scmp.lt.s32.totalorder %s1471_s15, %s2561_s9 }
 0xd26   : > { %p2000_p2 = scmp.lt.s32.totalorder %s1998_s26, %s1994_s24 }
 0xd27   : > { %p1996_p8 = pnand %p1995_p1, %p2590_p9 }
 0xd28   : > { %p2001_p4 = por %p2000_p2, %p1999_p5 }
 0xd29   : > { %p1997_p11 = pneg %p1996_p8 }
 0xd2b   : > { %p2002_p6 = pnand %p2001_p4, %p1997_p11 }
 0xd2d   : > { %2005 = shalt.err (!%p2002_p6)
}
 0xd2e   : > { %1776 = dma.vmem_to_hbm [thread:$0]  (%p2590_p9), %s1474_s0, 128, %s1471_s15, %s1460_s20  }
 0xd2f PF: > { %s1485_s4 = sand.u32 1, %s2044_s30   ;;  %p2591_p12 = scmp.ne.s32.totalorder %s2572_s16, 0 }
 0xd30   : > { %p2592_p3 = scmp.ge.s32.totalorder %s2056_s12, 2  ;;  %s1486_s7 = scalar_lea.sflag [#allocation4], %s1485_s4 }
 0xd32   : > { %p1793_p7 = pnand %p2592_p3, %p2591_p12 }
 0xd34   : > { %p1794_p13 = pneg %p1793_p7 }
 0xd36   : > { %2039 = dma.done.wait (%p1794_p13), %s1486_s7, 128  }
 0xd37   : > { %2041 = vsyncadd (%p1794_p13), %s1486_s7, 4294967168  ;;  %s2593_s29 = sld [smem:[#allocation16_spill]]  ;;  %p26_p10 = scmp.ge.s32.totalorder %s2192_s18, 4  }
 0xd38   : > { %s2594_s11 = sld [smem:[#allocation17_spill]]  ;;  %s2595_s30 = smov %s2048_s10 }
 0xd39   : > { %s2597_s12 = smov %s2192_s18  ;;  %28 = sbr.rel (!%p26_p10) target bundleno = 12 (0xc), region = 123 }
 0xd3d   : > { %s2596_s10 = smov %s2593_s29 }
 0xd3e   :  { %1491 = vsyncpa [#allocation3], 1 }
 0xd3f   :  { %1493 = vsyncpa [#allocation3 + $0x1], 1 }
 0xd40   :  { %1494 = vsyncpa [#allocation6], 1 }
 0xd41   :  { %1496 = vsyncpa [#allocation6 + $0x1], 1 }
 0xd42   :  { %1497 = vsyncpa [#allocation9], 1 }
 0xd43   :  { %1498 = vsyncpa [#allocation4], 1 }
 0xd44   :  { %1500 = vsyncpa [#allocation4 + $0x1], 1 }

</bundles_post_ra>
